<compile_context>
chip_gen: v7x
topology: tpu7x:2x2x1
jax: 0.10.0
libtpu: 0.0.40
codegen_flags: <defaults>
</compile_context>

<pallas_src>
import functools

import jax
import jax.numpy as jnp
from jax.experimental import pallas as pl
from jax.experimental.pallas import tpu as pltpu


# ----------------------------------------------------------------------------
# Hardware-aware configuration
# ----------------------------------------------------------------------------
@functools.lru_cache(maxsize=1)
def _hw_config():
    """Generation-aware scoped-VMEM budget and tile targets."""
    vmem_bytes = 64 * 1024 * 1024  # conservative default if the query fails
    try:
        info = pltpu.get_tpu_info()
        for attr in ("vmem_capacity_bytes", "vmem_bytes"):
            v = getattr(info, attr, None)
            if v:
                vmem_bytes = int(v)
                break
    except Exception:
        pass
    if vmem_bytes >= 100 * 1024 * 1024:
        # 128 MiB parts (v5e / v6e): big tiles reach the HBM roofline.
        return dict(vmem_limit=64 * 1024 * 1024,
                    tm=512, tn=512, tk=1024, tq=256, tkv=512)
    # 64 MiB parts (v7x): conservative — double-buffered specs count twice.
    return dict(vmem_limit=32 * 1024 * 1024,
                tm=256, tn=256, tk=512, tq=128, tkv=256)


def _sublane_quantum(dtype):
    # 8 for f32, 16 for bf16, 32 for int8/fp8 (sub-32-bit packs along sublanes).
    bits = jnp.dtype(dtype).itemsize * 8
    return max(8, 256 // bits)


def _pick_tile(dim, target, quantum):
    """Largest tile <= target that divides `dim` and is a multiple of `quantum`.

    Full-extent blocks are always legal, so dim <= target returns dim.  If no
    aligned divisor exists we fall back to the full dimension, but refuse to do
    so silently for absurdly large dims (review: clamp/assert, don't blow VMEM).
    """
    if dim <= target:
        return dim
    t = (target // quantum) * quantum
    while t >= quantum:
        if dim % t == 0:
            return t
        t -= quantum
    assert dim <= 8 * target, (
        f"no {quantum}-aligned tile <= {target} divides {dim}; refusing to "
        f"fall back to a {dim}-wide un-tiled block")
    return dim


# ----------------------------------------------------------------------------
# Tiled linear kernels: y = x @ W (+ b)
#   grid = (M/tm, N/tn, K/tk); f32 VMEM accumulator; K axis last ("arbitrary").
# ----------------------------------------------------------------------------
def _matmul_kernel(x_ref, w_ref, o_ref, acc_ref):
    @pl.when(pl.program_id(2) == 0)
    def _():
        acc_ref[...] = jnp.zeros_like(acc_ref)

    acc_ref[...] += jnp.dot(x_ref[...], w_ref[...],
                            preferred_element_type=jnp.float32)

    @pl.when(pl.program_id(2) == pl.num_programs(2) - 1)
    def _():
        o_ref[...] = acc_ref[...].astype(o_ref.dtype)


def _matmul_bias_kernel(x_ref, w_ref, b_ref, o_ref, acc_ref):
    @pl.when(pl.program_id(2) == 0)
    def _():
        acc_ref[...] = jnp.zeros_like(acc_ref)

    acc_ref[...] += jnp.dot(x_ref[...], w_ref[...],
                            preferred_element_type=jnp.float32)

    @pl.when(pl.program_id(2) == pl.num_programs(2) - 1)
    def _():
        o_ref[...] = (acc_ref[...] + b_ref[...].astype(jnp.float32)
                      ).astype(o_ref.dtype)


def linear(x2d, w, b=None, *, mxu_dtype=jnp.bfloat16, out_dtype=None):
    """y = x2d @ w (+ b).  bf16 MXU operands by default, f32 accumulation.

    The bias path is skipped entirely when b is None (qkv_bias=False).
    """
    M, K = x2d.shape
    Kw, N = w.shape
    assert K == Kw
    if out_dtype is None:
        out_dtype = x2d.dtype
    if mxu_dtype is not None:
        x2d = x2d.astype(mxu_dtype)
        w = w.astype(mxu_dtype)

    cfg = _hw_config()
    subq = _sublane_quantum(x2d.dtype)
    tm = _pick_tile(M, cfg["tm"], subq)
    tk = _pick_tile(K, cfg["tk"], 128)
    tn = _pick_tile(N, cfg["tn"], 128)
    grid = (M // tm, N // tn, K // tk)

    x_spec = pl.BlockSpec((tm, tk), lambda i, j, k: (i, k))
    w_spec = pl.BlockSpec((tk, tn), lambda i, j, k: (k, j))
    o_spec = pl.BlockSpec((tm, tn), lambda i, j, k: (i, j))
    compiler_params = pltpu.CompilerParams(
        dimension_semantics=("parallel", "parallel", "arbitrary"),
        vmem_limit_bytes=cfg["vmem_limit"])

    if b is None:
        return pl.pallas_call(
            _matmul_kernel,
            out_shape=jax.ShapeDtypeStruct((M, N), out_dtype),
            grid_spec=pltpu.PrefetchScalarGridSpec(
                num_scalar_prefetch=0, grid=grid,
                in_specs=[x_spec, w_spec], out_specs=o_spec,
                scratch_shapes=[pltpu.VMEM((tm, tn), jnp.float32)]),
            compiler_params=compiler_params,
        )(x2d, w)

    b2d = b.reshape(1, N).astype(jnp.float32)
    b_spec = pl.BlockSpec((1, tn), lambda i, j, k: (0, j))
    return pl.pallas_call(
        _matmul_bias_kernel,
        out_shape=jax.ShapeDtypeStruct((M, N), out_dtype),
        grid_spec=pltpu.PrefetchScalarGridSpec(
            num_scalar_prefetch=0, grid=grid,
            in_specs=[x_spec, w_spec, b_spec], out_specs=o_spec,
            scratch_shapes=[pltpu.VMEM((tm, tn), jnp.float32)]),
        compiler_params=compiler_params,
    )(x2d, w, b2d)


# ----------------------------------------------------------------------------
# Flash-style multi-head attention
#   grid = (B, L/tq, L/tkv); online softmax with per-head running statistics
#   held in VMEM scratch across the innermost ("arbitrary") kv axis.
#   q is pre-scaled (scale folded into Wq in the wrapper).
# ----------------------------------------------------------------------------
def _flash_attn_kernel(q_ref, k_ref, v_ref, o_ref, m_ref, l_ref, acc_ref,
                       *, num_heads):
    ki = pl.program_id(2)

    @pl.when(ki == 0)
    def _init():
        m_ref[...] = jnp.full_like(m_ref, -jnp.inf)
        l_ref[...] = jnp.zeros_like(l_ref)
        acc_ref[...] = jnp.zeros_like(acc_ref)

    q = q_ref[0]                       # (tq, C)  lane-dense
    k = k_ref[0]                       # (tkv, C) lane-dense
    v = v_ref[0]                       # (tkv, C) lane-dense
    head_dim = q.shape[-1] // num_heads

    # Static unroll over heads: per-head live intermediates are only (tq, tkv),
    # never (H, L, L); head slices are static lane slices of the dense blocks.
    for h in range(num_heads):
        lo = h * head_dim
        q_h = q[:, lo:lo + head_dim]                       # (tq, D)
        k_h = k[:, lo:lo + head_dim]                       # (tkv, D)
        v_h = v[:, lo:lo + head_dim]                       # (tkv, D)

        # QK^T: contraction over D; transposed operand is consumed natively by
        # the MXU (no explicit k transpose / XLU work).
        s = jax.lax.dot_general(
            q_h, k_h, (((1,), (1,)), ((), ())),
            preferred_element_type=jnp.float32)            # (tq, tkv) f32

        m_prev = m_ref[h]                                  # (tq, 1)
        l_prev = l_ref[h]                                  # (tq, 1)
        m_new = jnp.maximum(m_prev, jnp.max(s, axis=-1, keepdims=True))
        alpha = jnp.exp(m_prev - m_new)                    # (tq, 1)
        p = jnp.exp(s - m_new)                             # (tq, tkv) f32

        l_ref[h] = alpha * l_prev + jnp.sum(p, axis=-1, keepdims=True)
        m_ref[h] = m_new

        pv = jnp.dot(p.astype(v_h.dtype), v_h,
                     preferred_element_type=jnp.float32)   # (tq, D) f32
        acc_ref[h] = alpha * acc_ref[h] + pv

    @pl.when(ki == pl.num_programs(2) - 1)
    def _finalize():
        # Exact reciprocal (approx=False) for parity with the PyTorch 'math'
        # path; O(tq*H) so the cost difference vs approx=True is negligible.
        parts = []
        for h in range(num_heads):
            inv = pl.reciprocal(l_ref[h], approx=False)    # (tq, 1)
            parts.append(acc_ref[h] * inv)                 # (tq, D)
        # Single lane-dense (tq, C) store straight into the (B, L, C) output.
        o_ref[0] = jnp.concatenate(parts, axis=-1).astype(o_ref.dtype)


def flash_attention(q, k, v, *, num_heads, out_dtype=None):
    B, L, C = q.shape
    assert C % num_heads == 0
    head_dim = C // num_heads
    if out_dtype is None:
        out_dtype = q.dtype

    cfg = _hw_config()
    subq = _sublane_quantum(q.dtype)
    tq = _pick_tile(L, cfg["tq"], subq)
    tkv = _pick_tile(L, cfg["tkv"], max(subq, 128))
    grid = (B, L // tq, L // tkv)

    kernel = functools.partial(_flash_attn_kernel, num_heads=num_heads)
    return pl.pallas_call(
        kernel,
        out_shape=jax.ShapeDtypeStruct((B, L, C), out_dtype),
        grid_spec=pltpu.PrefetchScalarGridSpec(
            num_scalar_prefetch=0, grid=grid,
            in_specs=[
                pl.BlockSpec((1, tq, C), lambda b, qi, ki: (b, qi, 0)),   # q
                pl.BlockSpec((1, tkv, C), lambda b, qi, ki: (b, ki, 0)),  # k
                pl.BlockSpec((1, tkv, C), lambda b, qi, ki: (b, ki, 0)),  # v
            ],
            out_specs=pl.BlockSpec((1, tq, C), lambda b, qi, ki: (b, qi, 0)),
            scratch_shapes=[
                pltpu.VMEM((num_heads, tq, 1), jnp.float32),         # running max
                pltpu.VMEM((num_heads, tq, 1), jnp.float32),         # running denom
                pltpu.VMEM((num_heads, tq, head_dim), jnp.float32),  # running PV acc
            ]),
        compiler_params=pltpu.CompilerParams(
            dimension_semantics=("parallel", "parallel", "arbitrary"),
            vmem_limit_bytes=cfg["vmem_limit"]),
    )(q, k, v)


# ----------------------------------------------------------------------------
# Full Attention module forward pass.
# ----------------------------------------------------------------------------
def attention_forward(x, params, num_heads, *, mxu_dtype=jnp.bfloat16):
    B, L, C = x.shape
    H = num_heads
    assert C % H == 0
    D = C // H
    scale = D ** (-0.5)

    # Fold 1/sqrt(D) into the q weights in f32 BEFORE any bf16 cast.
    w_qkv = params["w_qkv"]                       # (C, 3C) as [Wq | Wk | Wv]
    w_q = w_qkv[:, 0 * C:1 * C] * jnp.asarray(scale, w_qkv.dtype)
    w_k = w_qkv[:, 1 * C:2 * C]
    w_v = w_qkv[:, 2 * C:3 * C]

    compute_dtype = x.dtype if mxu_dtype is None else mxu_dtype
    x2d = x.reshape(B * L, C)

    # Three lane-dense (B*L, C) projections (qkv_bias=False -> no bias path).
    q = linear(x2d, w_q, None, mxu_dtype=mxu_dtype, out_dtype=compute_dtype)
    k = linear(x2d, w_k, None, mxu_dtype=mxu_dtype, out_dtype=compute_dtype)
    v = linear(x2d, w_v, None, mxu_dtype=mxu_dtype, out_dtype=compute_dtype)

    o = flash_attention(q.reshape(B, L, C), k.reshape(B, L, C),
                        v.reshape(B, L, C), num_heads=H,
                        out_dtype=compute_dtype)                     # (B, L, C)

    # Output projection (bias=True); proj_drop(p=0.0) is the identity.
    out = linear(o.reshape(B * L, C), params["w_proj"], params["b_proj"],
                 mxu_dtype=mxu_dtype, out_dtype=x.dtype)
    return out.reshape(B, L, C)


def init_params(key, dim):
    k1, k2, k3 = jax.random.split(key, 3)
    std = 0.2
    return {
        # stored (in_features, out_features) so kernels compute x @ W
        "w_qkv": jax.random.normal(k1, (dim, dim * 3), jnp.float32) * std,
        "w_proj": jax.random.normal(k2, (dim, dim), jnp.float32) * std,
        "b_proj": jax.random.normal(k3, (dim,), jnp.float32) * std,
    }


def ref_attention(x, params, num_heads):
    """Pure-JAX reference (same math as the PyTorch 'math' attention mode)."""
    B, L, C = x.shape
    D = C // num_heads
    scale = D ** (-0.5)
    hp = jax.lax.Precision.HIGHEST
    qkv = jnp.einsum("blc,cn->bln", x, params["w_qkv"], precision=hp)
    qkv = qkv.reshape(B, L, 3, num_heads, D).transpose(2, 0, 3, 1, 4)
    q, k, v = qkv[0], qkv[1], qkv[2]
    s = jnp.einsum("bhld,bhmd->bhlm", q, k, precision=hp) * scale
    p = jax.nn.softmax(s, axis=-1)
    o = jnp.einsum("bhlm,bhmd->bhld", p, v, precision=hp)
    o = o.transpose(0, 2, 1, 3).reshape(B, L, C)
    return jnp.einsum("blc,cn->bln", o, params["w_proj"],
                      precision=hp) + params["b_proj"]


if __name__ == "__main__":
    B, L, C = 2, 8, 32
    num_heads = 8

    key = jax.random.PRNGKey(0)
    kx, kp = jax.random.split(key)
    x = jax.random.normal(kx, (B, L, C), jnp.float32)
    params = init_params(kp, C)

    expected = ref_attention(x, params, num_heads)

    # Exact-parity check on the f32 MXU path (f32 operands, f32 accumulation).
    fwd_f32 = jax.jit(functools.partial(attention_forward,
                                        num_heads=num_heads, mxu_dtype=None))
    out_f32 = fwd_f32(x, params)
    jax.block_until_ready(out_f32)
    assert out_f32.shape == expected.shape
    assert jnp.allclose(out_f32, expected, atol=1e-4, rtol=1e-3), \
        "f32 path mismatch vs reference"

    # Default path: bf16 MXU operands, f32 accumulation / f32 softmax stats.
    fwd = jax.jit(functools.partial(attention_forward, num_heads=num_heads))
    out_bf16 = fwd(x, params)
    jax.block_until_ready(out_bf16)
    assert out_bf16.shape == expected.shape
    assert bool(jnp.isfinite(out_bf16).all())
    assert jnp.allclose(out_bf16, expected, atol=2e-1, rtol=1e-1), \
        "bf16 path drifted too far from reference"

    print("KERNEL_OK")
</pallas_src>

<mosaic_0001>
module attributes {stable_mosaic.version = 11 : i64} {
  func.func @_matmul_bias_kernel(%arg0: i32, %arg1: i32, %arg2: i32, %arg3: memref<16x32xf32, #tpu.memory_space<vmem>>, %arg4: memref<32x32xf32, #tpu.memory_space<vmem>>, %arg5: memref<1x32xf32, #tpu.memory_space<vmem>>, %arg6: memref<16x32xf32, #tpu.memory_space<vmem>>, %arg7: memref<16x32xf32, #tpu.memory_space<vmem>>) attributes {dimension_semantics = [#tpu.dimension_semantics<parallel>, #tpu.dimension_semantics<parallel>, #tpu.dimension_semantics<arbitrary>], iteration_bounds = array<i64: 1, 1, 1>, scalar_prefetch = 0 : i64, scratch_operands = 1 : i64, tpu.core_type = #tpu.core_type<tc>, window_params = [{transform_indices = @transform_0, window_bounds = array<i64: 16, 32>}, {transform_indices = @transform_1, window_bounds = array<i64: 32, 32>}, {transform_indices = @transform_2, window_bounds = array<i64: 1, 32>}, {transform_indices = @transform_3, window_bounds = array<i64: 16, 32>}]} {
    %c0_i32 = arith.constant 0 : i32
    %0 = arith.cmpi eq, %arg2, %c0_i32 : i32
    %1 = arith.extui %0 : i1 to i32
    %c0_i32_0 = arith.constant 0 : i32
    %2 = arith.cmpi ne, %1, %c0_i32_0 : i32
    scf.if %2 {
      %cst_10 = arith.constant 0.000000e+00 : f32
      %12 = vector.broadcast %cst_10 : f32 to vector<16x32xf32>
      %c0_11 = arith.constant 0 : index
      %c0_12 = arith.constant 0 : index
      %13 = vector.load %arg7[%c0_11, %c0_12] : memref<16x32xf32, #tpu.memory_space<vmem>>, vector<16x32xf32>
      tpu.vector_store %arg7[%c0_11, %c0_12], %12 {strides = array<i32>} : memref<16x32xf32, #tpu.memory_space<vmem>>, vector<16x32xf32>,
    } else {
    }
    %c0 = arith.constant 0 : index
    %c0_1 = arith.constant 0 : index
    %3 = vector.load %arg7[%c0, %c0_1] : memref<16x32xf32, #tpu.memory_space<vmem>>, vector<16x32xf32>
    %c0_2 = arith.constant 0 : index
    %c0_3 = arith.constant 0 : index
    %4 = vector.load %arg3[%c0_2, %c0_3] : memref<16x32xf32, #tpu.memory_space<vmem>>, vector<16x32xf32>
    %c0_4 = arith.constant 0 : index
    %c0_5 = arith.constant 0 : index
    %5 = vector.load %arg4[%c0_4, %c0_5] : memref<32x32xf32, #tpu.memory_space<vmem>>, vector<32x32xf32>
    %cst = arith.constant dense<0.000000e+00> : vector<16x32xf32>
    %6 = tpu.matmul %4, %5, %cst {dimension_numbers = #tpu.dot_dimension_numbers<[1], [0], [0], [1], [0, 0, 1, 1], [], []>} : vector<16x32xf32>, vector<32x32xf32>, vector<16x32xf32> -> vector<16x32xf32>
    %7 = arith.addf %3, %6 : vector<16x32xf32>
    %c0_6 = arith.constant 0 : index
    %c0_7 = arith.constant 0 : index
    %8 = vector.load %arg7[%c0_6, %c0_7] : memref<16x32xf32, #tpu.memory_space<vmem>>, vector<16x32xf32>
    tpu.vector_store %arg7[%c0_6, %c0_7], %7 {strides = array<i32>} : memref<16x32xf32, #tpu.memory_space<vmem>>, vector<16x32xf32>,
    %c0_i32_8 = arith.constant 0 : i32
    %9 = arith.cmpi eq, %arg2, %c0_i32_8 : i32
    %10 = arith.extui %9 : i1 to i32
    %c0_i32_9 = arith.constant 0 : i32
    %11 = arith.cmpi ne, %10, %c0_i32_9 : i32
    scf.if %11 {
      %c0_10 = arith.constant 0 : index
      %c0_11 = arith.constant 0 : index
      %12 = vector.load %arg7[%c0_10, %c0_11] : memref<16x32xf32, #tpu.memory_space<vmem>>, vector<16x32xf32>
      %c0_12 = arith.constant 0 : index
      %c0_13 = arith.constant 0 : index
      %13 = vector.load %arg5[%c0_12, %c0_13] : memref<1x32xf32, #tpu.memory_space<vmem>>, vector<1x32xf32>
      %14 = vector.broadcast %13 : vector<1x32xf32> to vector<16x32xf32>
      %15 = arith.addf %12, %14 : vector<16x32xf32>
      %c0_14 = arith.constant 0 : index
      %c0_15 = arith.constant 0 : index
      %16 = vector.load %arg6[%c0_14, %c0_15] : memref<16x32xf32, #tpu.memory_space<vmem>>, vector<16x32xf32>
      tpu.vector_store %arg6[%c0_14, %c0_15], %15 {strides = array<i32>} : memref<16x32xf32, #tpu.memory_space<vmem>>, vector<16x32xf32>,
    } else {
    }
    return
  }
  func.func @transform_0(%arg0: i32, %arg1: i32, %arg2: i32) -> (i32, i32) {
    %c0_i32 = arith.constant 0 : i32
    return %arg0, %arg2 : i32, i32
  }
  func.func @transform_1(%arg0: i32, %arg1: i32, %arg2: i32) -> (i32, i32) {
    %c0_i32 = arith.constant 0 : i32
    return %arg2, %arg1 : i32, i32
  }
  func.func @transform_2(%arg0: i32, %arg1: i32, %arg2: i32) -> (i32, i32) {
    %c0_i32 = arith.constant 0 : i32
    %c0_i32_0 = arith.constant 0 : i32
    return %c0_i32, %arg1 : i32, i32
  }
  func.func @transform_3(%arg0: i32, %arg1: i32, %arg2: i32) -> (i32, i32) {
    %c0_i32 = arith.constant 0 : i32
    return %arg0, %arg1 : i32, i32
  }
}

module attributes {stable_mosaic.version = 11 : i64} {
  func.func @_matmul_kernel(%arg0: i32, %arg1: i32, %arg2: i32, %arg3: memref<16x32xf32, #tpu.memory_space<vmem>>, %arg4: memref<32x32xf32, #tpu.memory_space<vmem>>, %arg5: memref<16x32xf32, #tpu.memory_space<vmem>>, %arg6: memref<16x32xf32, #tpu.memory_space<vmem>>) attributes {dimension_semantics = [#tpu.dimension_semantics<parallel>, #tpu.dimension_semantics<parallel>, #tpu.dimension_semantics<arbitrary>], iteration_bounds = array<i64: 1, 1, 1>, scalar_prefetch = 0 : i64, scratch_operands = 1 : i64, tpu.core_type = #tpu.core_type<tc>, window_params = [{transform_indices = @transform_0, window_bounds = array<i64: 16, 32>}, {transform_indices = @transform_1, window_bounds = array<i64: 32, 32>}, {transform_indices = @transform_2, window_bounds = array<i64: 16, 32>}]} {
    %c0_i32 = arith.constant 0 : i32
    %0 = arith.cmpi eq, %arg2, %c0_i32 : i32
    %1 = arith.extui %0 : i1 to i32
    %c0_i32_0 = arith.constant 0 : i32
    %2 = arith.cmpi ne, %1, %c0_i32_0 : i32
    scf.if %2 {
      %cst_10 = arith.constant 0.000000e+00 : f32
      %12 = vector.broadcast %cst_10 : f32 to vector<16x32xf32>
      %c0_11 = arith.constant 0 : index
      %c0_12 = arith.constant 0 : index
      %13 = vector.load %arg6[%c0_11, %c0_12] : memref<16x32xf32, #tpu.memory_space<vmem>>, vector<16x32xf32>
      tpu.vector_store %arg6[%c0_11, %c0_12], %12 {strides = array<i32>} : memref<16x32xf32, #tpu.memory_space<vmem>>, vector<16x32xf32>,
    } else {
    }
    %c0 = arith.constant 0 : index
    %c0_1 = arith.constant 0 : index
    %3 = vector.load %arg6[%c0, %c0_1] : memref<16x32xf32, #tpu.memory_space<vmem>>, vector<16x32xf32>
    %c0_2 = arith.constant 0 : index
    %c0_3 = arith.constant 0 : index
    %4 = vector.load %arg3[%c0_2, %c0_3] : memref<16x32xf32, #tpu.memory_space<vmem>>, vector<16x32xf32>
    %c0_4 = arith.constant 0 : index
    %c0_5 = arith.constant 0 : index
    %5 = vector.load %arg4[%c0_4, %c0_5] : memref<32x32xf32, #tpu.memory_space<vmem>>, vector<32x32xf32>
    %cst = arith.constant dense<0.000000e+00> : vector<16x32xf32>
    %6 = tpu.matmul %4, %5, %cst {dimension_numbers = #tpu.dot_dimension_numbers<[1], [0], [0], [1], [0, 0, 1, 1], [], []>} : vector<16x32xf32>, vector<32x32xf32>, vector<16x32xf32> -> vector<16x32xf32>
    %7 = arith.addf %3, %6 : vector<16x32xf32>
    %c0_6 = arith.constant 0 : index
    %c0_7 = arith.constant 0 : index
    %8 = vector.load %arg6[%c0_6, %c0_7] : memref<16x32xf32, #tpu.memory_space<vmem>>, vector<16x32xf32>
    tpu.vector_store %arg6[%c0_6, %c0_7], %7 {strides = array<i32>} : memref<16x32xf32, #tpu.memory_space<vmem>>, vector<16x32xf32>,
    %c0_i32_8 = arith.constant 0 : i32
    %9 = arith.cmpi eq, %arg2, %c0_i32_8 : i32
    %10 = arith.extui %9 : i1 to i32
    %c0_i32_9 = arith.constant 0 : i32
    %11 = arith.cmpi ne, %10, %c0_i32_9 : i32
    scf.if %11 {
      %c0_10 = arith.constant 0 : index
      %c0_11 = arith.constant 0 : index
      %12 = vector.load %arg6[%c0_10, %c0_11] : memref<16x32xf32, #tpu.memory_space<vmem>>, vector<16x32xf32>
      %c0_12 = arith.constant 0 : index
      %c0_13 = arith.constant 0 : index
      %13 = vector.load %arg5[%c0_12, %c0_13] : memref<16x32xf32, #tpu.memory_space<vmem>>, vector<16x32xf32>
      tpu.vector_store %arg5[%c0_12, %c0_13], %12 {strides = array<i32>} : memref<16x32xf32, #tpu.memory_space<vmem>>, vector<16x32xf32>,
    } else {
    }
    return
  }
  func.func @transform_0(%arg0: i32, %arg1: i32, %arg2: i32) -> (i32, i32) {
    %c0_i32 = arith.constant 0 : i32
    return %arg0, %arg2 : i32, i32
  }
  func.func @transform_1(%arg0: i32, %arg1: i32, %arg2: i32) -> (i32, i32) {
    %c0_i32 = arith.constant 0 : i32
    return %arg2, %arg1 : i32, i32
  }
  func.func @transform_2(%arg0: i32, %arg1: i32, %arg2: i32) -> (i32, i32) {
    %c0_i32 = arith.constant 0 : i32
    return %arg0, %arg1 : i32, i32
  }
}

module attributes {stable_mosaic.version = 11 : i64} {
  func.func @_flash_attn_kernel(%arg0: i32, %arg1: i32, %arg2: i32, %arg3: memref<1x8x32xf32, #tpu.memory_space<vmem>>, %arg4: memref<1x8x32xf32, #tpu.memory_space<vmem>>, %arg5: memref<1x8x32xf32, #tpu.memory_space<vmem>>, %arg6: memref<1x8x32xf32, #tpu.memory_space<vmem>>, %arg7: memref<8x8x1xf32, #tpu.memory_space<vmem>>, %arg8: memref<8x8x1xf32, #tpu.memory_space<vmem>>, %arg9: memref<8x8x4xf32, #tpu.memory_space<vmem>>) attributes {dimension_semantics = [#tpu.dimension_semantics<parallel>, #tpu.dimension_semantics<parallel>, #tpu.dimension_semantics<arbitrary>], iteration_bounds = array<i64: 2, 1, 1>, scalar_prefetch = 0 : i64, scratch_operands = 3 : i64, tpu.core_type = #tpu.core_type<tc>, window_params = [{transform_indices = @transform_0, window_bounds = array<i64: 1, 8, 32>}, {transform_indices = @transform_1, window_bounds = array<i64: 1, 8, 32>}, {transform_indices = @transform_2, window_bounds = array<i64: 1, 8, 32>}, {transform_indices = @transform_3, window_bounds = array<i64: 1, 8, 32>}]} {
    %c0_i32 = arith.constant 0 : i32
    %0 = arith.cmpi eq, %arg2, %c0_i32 : i32
    %1 = arith.extui %0 : i1 to i32
    %c0_i32_0 = arith.constant 0 : i32
    %2 = arith.cmpi ne, %1, %c0_i32_0 : i32
    scf.if %2 {
      %cst_179 = arith.constant 0xFF800000 : f32
      %292 = vector.broadcast %cst_179 : f32 to vector<8x8x1xf32>
      %c0_180 = arith.constant 0 : index
      %c0_181 = arith.constant 0 : index
      %c0_182 = arith.constant 0 : index
      %293 = vector.load %arg7[%c0_180, %c0_181, %c0_182] : memref<8x8x1xf32, #tpu.memory_space<vmem>>, vector<8x8x1xf32>
      tpu.vector_store %arg7[%c0_180, %c0_181, %c0_182], %292 {strides = array<i32>} : memref<8x8x1xf32, #tpu.memory_space<vmem>>, vector<8x8x1xf32>,
      %cst_183 = arith.constant 0.000000e+00 : f32
      %294 = vector.broadcast %cst_183 : f32 to vector<8x8x1xf32>
      %c0_184 = arith.constant 0 : index
      %c0_185 = arith.constant 0 : index
      %c0_186 = arith.constant 0 : index
      %295 = vector.load %arg8[%c0_184, %c0_185, %c0_186] : memref<8x8x1xf32, #tpu.memory_space<vmem>>, vector<8x8x1xf32>
      tpu.vector_store %arg8[%c0_184, %c0_185, %c0_186], %294 {strides = array<i32>} : memref<8x8x1xf32, #tpu.memory_space<vmem>>, vector<8x8x1xf32>,
      %cst_187 = arith.constant 0.000000e+00 : f32
      %296 = vector.broadcast %cst_187 : f32 to vector<8x8x4xf32>
      %c0_188 = arith.constant 0 : index
      %c0_189 = arith.constant 0 : index
      %c0_190 = arith.constant 0 : index
      %297 = vector.load %arg9[%c0_188, %c0_189, %c0_190] : memref<8x8x4xf32, #tpu.memory_space<vmem>>, vector<8x8x4xf32>
      tpu.vector_store %arg9[%c0_188, %c0_189, %c0_190], %296 {strides = array<i32>} : memref<8x8x4xf32, #tpu.memory_space<vmem>>, vector<8x8x4xf32>,
    } else {
    }
    %c0 = arith.constant 0 : index
    %c0_1 = arith.constant 0 : index
    %c0_2 = arith.constant 0 : index
    %3 = vector.load %arg3[%c0, %c0_1, %c0_2] : memref<1x8x32xf32, #tpu.memory_space<vmem>>, vector<1x8x32xf32>
    %4 = vector.shape_cast %3 : vector<1x8x32xf32> to vector<8x32xf32>
    %c0_3 = arith.constant 0 : index
    %c0_4 = arith.constant 0 : index
    %c0_5 = arith.constant 0 : index
    %5 = vector.load %arg4[%c0_3, %c0_4, %c0_5] : memref<1x8x32xf32, #tpu.memory_space<vmem>>, vector<1x8x32xf32>
    %6 = vector.shape_cast %5 : vector<1x8x32xf32> to vector<8x32xf32>
    %c0_6 = arith.constant 0 : index
    %c0_7 = arith.constant 0 : index
    %c0_8 = arith.constant 0 : index
    %7 = vector.load %arg5[%c0_6, %c0_7, %c0_8] : memref<1x8x32xf32, #tpu.memory_space<vmem>>, vector<1x8x32xf32>
    %8 = vector.shape_cast %7 : vector<1x8x32xf32> to vector<8x32xf32>
    %9 = vector.extract_strided_slice %4 {offsets = [0, 0], sizes = [8, 4], strides = [1, 1]} : vector<8x32xf32> to vector<8x4xf32>
    %10 = vector.extract_strided_slice %6 {offsets = [0, 0], sizes = [8, 4], strides = [1, 1]} : vector<8x32xf32> to vector<8x4xf32>
    %11 = vector.extract_strided_slice %8 {offsets = [0, 0], sizes = [8, 4], strides = [1, 1]} : vector<8x32xf32> to vector<8x4xf32>
    %cst = arith.constant dense<0.000000e+00> : vector<8x8xf32>
    %12 = tpu.matmul %9, %10, %cst {dimension_numbers = #tpu.dot_dimension_numbers<[1], [1], [0], [0], [0, 0, 1, 0], [], []>} : vector<8x4xf32>, vector<8x4xf32>, vector<8x8xf32> -> vector<8x8xf32>
    %c0_9 = arith.constant 0 : index
    %c0_10 = arith.constant 0 : index
    %c0_11 = arith.constant 0 : index
    %13 = vector.load %arg7[%c0_9, %c0_10, %c0_11] : memref<8x8x1xf32, #tpu.memory_space<vmem>>, vector<1x8x1xf32>
    %14 = vector.shape_cast %13 : vector<1x8x1xf32> to vector<8x1xf32>
    %c0_12 = arith.constant 0 : index
    %c0_13 = arith.constant 0 : index
    %c0_14 = arith.constant 0 : index
    %15 = vector.load %arg8[%c0_12, %c0_13, %c0_14] : memref<8x8x1xf32, #tpu.memory_space<vmem>>, vector<1x8x1xf32>
    %16 = vector.shape_cast %15 : vector<1x8x1xf32> to vector<8x1xf32>
    %cst_15 = arith.constant dense<0xFF800000> : vector<8xf32>
    %17 = vector.multi_reduction <maximumf>, %12, %cst_15 [1] : vector<8x8xf32> to vector<8xf32>
    %18 = vector.shape_cast %17 : vector<8xf32> to vector<8x1xf32>
    %19 = arith.maximumf %14, %18 : vector<8x1xf32>
    %20 = arith.subf %14, %19 : vector<8x1xf32>
    %21 = math.exp %20 : vector<8x1xf32>
    %22 = vector.broadcast %19 : vector<8x1xf32> to vector<8x8xf32>
    %23 = arith.subf %12, %22 : vector<8x8xf32>
    %24 = math.exp %23 : vector<8x8xf32>
    %25 = arith.mulf %21, %16 : vector<8x1xf32>
    %cst_16 = arith.constant dense<0.000000e+00> : vector<8xf32>
    %26 = vector.multi_reduction <add>, %24, %cst_16 [1] : vector<8x8xf32> to vector<8xf32>
    %27 = vector.shape_cast %26 : vector<8xf32> to vector<8x1xf32>
    %28 = arith.addf %25, %27 : vector<8x1xf32>
    %c0_17 = arith.constant 0 : index
    %c0_18 = arith.constant 0 : index
    %c0_19 = arith.constant 0 : index
    %29 = vector.load %arg8[%c0_17, %c0_18, %c0_19] : memref<8x8x1xf32, #tpu.memory_space<vmem>>, vector<1x8x1xf32>
    %30 = vector.shape_cast %29 : vector<1x8x1xf32> to vector<8x1xf32>
    %31 = vector.shape_cast %28 : vector<8x1xf32> to vector<1x8x1xf32>
    tpu.vector_store %arg8[%c0_17, %c0_18, %c0_19], %31 {strides = array<i32>} : memref<8x8x1xf32, #tpu.memory_space<vmem>>, vector<1x8x1xf32>,
    %c0_20 = arith.constant 0 : index
    %c0_21 = arith.constant 0 : index
    %c0_22 = arith.constant 0 : index
    %32 = vector.load %arg7[%c0_20, %c0_21, %c0_22] : memref<8x8x1xf32, #tpu.memory_space<vmem>>, vector<1x8x1xf32>
    %33 = vector.shape_cast %32 : vector<1x8x1xf32> to vector<8x1xf32>
    %34 = vector.shape_cast %19 : vector<8x1xf32> to vector<1x8x1xf32>
    tpu.vector_store %arg7[%c0_20, %c0_21, %c0_22], %34 {strides = array<i32>} : memref<8x8x1xf32, #tpu.memory_space<vmem>>, vector<1x8x1xf32>,
    %cst_23 = arith.constant dense<0.000000e+00> : vector<8x4xf32>
    %35 = tpu.matmul %24, %11, %cst_23 {dimension_numbers = #tpu.dot_dimension_numbers<[1], [0], [0], [1], [0, 0, 1, 1], [], []>} : vector<8x8xf32>, vector<8x4xf32>, vector<8x4xf32> -> vector<8x4xf32>
    %c0_24 = arith.constant 0 : index
    %c0_25 = arith.constant 0 : index
    %c0_26 = arith.constant 0 : index
    %36 = vector.load %arg9[%c0_24, %c0_25, %c0_26] : memref<8x8x4xf32, #tpu.memory_space<vmem>>, vector<1x8x4xf32>
    %37 = vector.shape_cast %36 : vector<1x8x4xf32> to vector<8x4xf32>
    %38 = vector.broadcast %21 : vector<8x1xf32> to vector<8x4xf32>
    %39 = arith.mulf %38, %37 : vector<8x4xf32>
    %40 = arith.addf %39, %35 : vector<8x4xf32>
    %c0_27 = arith.constant 0 : index
    %c0_28 = arith.constant 0 : index
    %c0_29 = arith.constant 0 : index
    %41 = vector.load %arg9[%c0_27, %c0_28, %c0_29] : memref<8x8x4xf32, #tpu.memory_space<vmem>>, vector<1x8x4xf32>
    %42 = vector.shape_cast %41 : vector<1x8x4xf32> to vector<8x4xf32>
    %43 = vector.shape_cast %40 : vector<8x4xf32> to vector<1x8x4xf32>
    tpu.vector_store %arg9[%c0_27, %c0_28, %c0_29], %43 {strides = array<i32>} : memref<8x8x4xf32, #tpu.memory_space<vmem>>, vector<1x8x4xf32>,
    %44 = vector.extract_strided_slice %4 {offsets = [0, 4], sizes = [8, 4], strides = [1, 1]} : vector<8x32xf32> to vector<8x4xf32>
    %45 = vector.extract_strided_slice %6 {offsets = [0, 4], sizes = [8, 4], strides = [1, 1]} : vector<8x32xf32> to vector<8x4xf32>
    %46 = vector.extract_strided_slice %8 {offsets = [0, 4], sizes = [8, 4], strides = [1, 1]} : vector<8x32xf32> to vector<8x4xf32>
    %cst_30 = arith.constant dense<0.000000e+00> : vector<8x8xf32>
    %47 = tpu.matmul %44, %45, %cst_30 {dimension_numbers = #tpu.dot_dimension_numbers<[1], [1], [0], [0], [0, 0, 1, 0], [], []>} : vector<8x4xf32>, vector<8x4xf32>, vector<8x8xf32> -> vector<8x8xf32>
    %c1 = arith.constant 1 : index
    %c0_31 = arith.constant 0 : index
    %c0_32 = arith.constant 0 : index
    %48 = vector.load %arg7[%c1, %c0_31, %c0_32] : memref<8x8x1xf32, #tpu.memory_space<vmem>>, vector<1x8x1xf32>
    %49 = vector.shape_cast %48 : vector<1x8x1xf32> to vector<8x1xf32>
    %c1_33 = arith.constant 1 : index
    %c0_34 = arith.constant 0 : index
    %c0_35 = arith.constant 0 : index
    %50 = vector.load %arg8[%c1_33, %c0_34, %c0_35] : memref<8x8x1xf32, #tpu.memory_space<vmem>>, vector<1x8x1xf32>
    %51 = vector.shape_cast %50 : vector<1x8x1xf32> to vector<8x1xf32>
    %cst_36 = arith.constant dense<0xFF800000> : vector<8xf32>
    %52 = vector.multi_reduction <maximumf>, %47, %cst_36 [1] : vector<8x8xf32> to vector<8xf32>
    %53 = vector.shape_cast %52 : vector<8xf32> to vector<8x1xf32>
    %54 = arith.maximumf %49, %53 : vector<8x1xf32>
    %55 = arith.subf %49, %54 : vector<8x1xf32>
    %56 = math.exp %55 : vector<8x1xf32>
    %57 = vector.broadcast %54 : vector<8x1xf32> to vector<8x8xf32>
    %58 = arith.subf %47, %57 : vector<8x8xf32>
    %59 = math.exp %58 : vector<8x8xf32>
    %60 = arith.mulf %56, %51 : vector<8x1xf32>
    %cst_37 = arith.constant dense<0.000000e+00> : vector<8xf32>
    %61 = vector.multi_reduction <add>, %59, %cst_37 [1] : vector<8x8xf32> to vector<8xf32>
    %62 = vector.shape_cast %61 : vector<8xf32> to vector<8x1xf32>
    %63 = arith.addf %60, %62 : vector<8x1xf32>
    %c1_38 = arith.constant 1 : index
    %c0_39 = arith.constant 0 : index
    %c0_40 = arith.constant 0 : index
    %64 = vector.load %arg8[%c1_38, %c0_39, %c0_40] : memref<8x8x1xf32, #tpu.memory_space<vmem>>, vector<1x8x1xf32>
    %65 = vector.shape_cast %64 : vector<1x8x1xf32> to vector<8x1xf32>
    %66 = vector.shape_cast %63 : vector<8x1xf32> to vector<1x8x1xf32>
    tpu.vector_store %arg8[%c1_38, %c0_39, %c0_40], %66 {strides = array<i32>} : memref<8x8x1xf32, #tpu.memory_space<vmem>>, vector<1x8x1xf32>,
    %c1_41 = arith.constant 1 : index
    %c0_42 = arith.constant 0 : index
    %c0_43 = arith.constant 0 : index
    %67 = vector.load %arg7[%c1_41, %c0_42, %c0_43] : memref<8x8x1xf32, #tpu.memory_space<vmem>>, vector<1x8x1xf32>
    %68 = vector.shape_cast %67 : vector<1x8x1xf32> to vector<8x1xf32>
    %69 = vector.shape_cast %54 : vector<8x1xf32> to vector<1x8x1xf32>
    tpu.vector_store %arg7[%c1_41, %c0_42, %c0_43], %69 {strides = array<i32>} : memref<8x8x1xf32, #tpu.memory_space<vmem>>, vector<1x8x1xf32>,
    %cst_44 = arith.constant dense<0.000000e+00> : vector<8x4xf32>
    %70 = tpu.matmul %59, %46, %cst_44 {dimension_numbers = #tpu.dot_dimension_numbers<[1], [0], [0], [1], [0, 0, 1, 1], [], []>} : vector<8x8xf32>, vector<8x4xf32>, vector<8x4xf32> -> vector<8x4xf32>
    %c1_45 = arith.constant 1 : index
    %c0_46 = arith.constant 0 : index
    %c0_47 = arith.constant 0 : index
    %71 = vector.load %arg9[%c1_45, %c0_46, %c0_47] : memref<8x8x4xf32, #tpu.memory_space<vmem>>, vector<1x8x4xf32>
    %72 = vector.shape_cast %71 : vector<1x8x4xf32> to vector<8x4xf32>
    %73 = vector.broadcast %56 : vector<8x1xf32> to vector<8x4xf32>
    %74 = arith.mulf %73, %72 : vector<8x4xf32>
    %75 = arith.addf %74, %70 : vector<8x4xf32>
    %c1_48 = arith.constant 1 : index
    %c0_49 = arith.constant 0 : index
    %c0_50 = arith.constant 0 : index
    %76 = vector.load %arg9[%c1_48, %c0_49, %c0_50] : memref<8x8x4xf32, #tpu.memory_space<vmem>>, vector<1x8x4xf32>
    %77 = vector.shape_cast %76 : vector<1x8x4xf32> to vector<8x4xf32>
    %78 = vector.shape_cast %75 : vector<8x4xf32> to vector<1x8x4xf32>
    tpu.vector_store %arg9[%c1_48, %c0_49, %c0_50], %78 {strides = array<i32>} : memref<8x8x4xf32, #tpu.memory_space<vmem>>, vector<1x8x4xf32>,
    %79 = vector.extract_strided_slice %4 {offsets = [0, 8], sizes = [8, 4], strides = [1, 1]} : vector<8x32xf32> to vector<8x4xf32>
    %80 = vector.extract_strided_slice %6 {offsets = [0, 8], sizes = [8, 4], strides = [1, 1]} : vector<8x32xf32> to vector<8x4xf32>
    %81 = vector.extract_strided_slice %8 {offsets = [0, 8], sizes = [8, 4], strides = [1, 1]} : vector<8x32xf32> to vector<8x4xf32>
    %cst_51 = arith.constant dense<0.000000e+00> : vector<8x8xf32>
    %82 = tpu.matmul %79, %80, %cst_51 {dimension_numbers = #tpu.dot_dimension_numbers<[1], [1], [0], [0], [0, 0, 1, 0], [], []>} : vector<8x4xf32>, vector<8x4xf32>, vector<8x8xf32> -> vector<8x8xf32>
    %c2 = arith.constant 2 : index
    %c0_52 = arith.constant 0 : index
    %c0_53 = arith.constant 0 : index
    %83 = vector.load %arg7[%c2, %c0_52, %c0_53] : memref<8x8x1xf32, #tpu.memory_space<vmem>>, vector<1x8x1xf32>
    %84 = vector.shape_cast %83 : vector<1x8x1xf32> to vector<8x1xf32>
    %c2_54 = arith.constant 2 : index
    %c0_55 = arith.constant 0 : index
    %c0_56 = arith.constant 0 : index
    %85 = vector.load %arg8[%c2_54, %c0_55, %c0_56] : memref<8x8x1xf32, #tpu.memory_space<vmem>>, vector<1x8x1xf32>
    %86 = vector.shape_cast %85 : vector<1x8x1xf32> to vector<8x1xf32>
    %cst_57 = arith.constant dense<0xFF800000> : vector<8xf32>
    %87 = vector.multi_reduction <maximumf>, %82, %cst_57 [1] : vector<8x8xf32> to vector<8xf32>
    %88 = vector.shape_cast %87 : vector<8xf32> to vector<8x1xf32>
    %89 = arith.maximumf %84, %88 : vector<8x1xf32>
    %90 = arith.subf %84, %89 : vector<8x1xf32>
    %91 = math.exp %90 : vector<8x1xf32>
    %92 = vector.broadcast %89 : vector<8x1xf32> to vector<8x8xf32>
    %93 = arith.subf %82, %92 : vector<8x8xf32>
    %94 = math.exp %93 : vector<8x8xf32>
    %95 = arith.mulf %91, %86 : vector<8x1xf32>
    %cst_58 = arith.constant dense<0.000000e+00> : vector<8xf32>
    %96 = vector.multi_reduction <add>, %94, %cst_58 [1] : vector<8x8xf32> to vector<8xf32>
    %97 = vector.shape_cast %96 : vector<8xf32> to vector<8x1xf32>
    %98 = arith.addf %95, %97 : vector<8x1xf32>
    %c2_59 = arith.constant 2 : index
    %c0_60 = arith.constant 0 : index
    %c0_61 = arith.constant 0 : index
    %99 = vector.load %arg8[%c2_59, %c0_60, %c0_61] : memref<8x8x1xf32, #tpu.memory_space<vmem>>, vector<1x8x1xf32>
    %100 = vector.shape_cast %99 : vector<1x8x1xf32> to vector<8x1xf32>
    %101 = vector.shape_cast %98 : vector<8x1xf32> to vector<1x8x1xf32>
    tpu.vector_store %arg8[%c2_59, %c0_60, %c0_61], %101 {strides = array<i32>} : memref<8x8x1xf32, #tpu.memory_space<vmem>>, vector<1x8x1xf32>,
    %c2_62 = arith.constant 2 : index
    %c0_63 = arith.constant 0 : index
    %c0_64 = arith.constant 0 : index
    %102 = vector.load %arg7[%c2_62, %c0_63, %c0_64] : memref<8x8x1xf32, #tpu.memory_space<vmem>>, vector<1x8x1xf32>
    %103 = vector.shape_cast %102 : vector<1x8x1xf32> to vector<8x1xf32>
    %104 = vector.shape_cast %89 : vector<8x1xf32> to vector<1x8x1xf32>
    tpu.vector_store %arg7[%c2_62, %c0_63, %c0_64], %104 {strides = array<i32>} : memref<8x8x1xf32, #tpu.memory_space<vmem>>, vector<1x8x1xf32>,
    %cst_65 = arith.constant dense<0.000000e+00> : vector<8x4xf32>
    %105 = tpu.matmul %94, %81, %cst_65 {dimension_numbers = #tpu.dot_dimension_numbers<[1], [0], [0], [1], [0, 0, 1, 1], [], []>} : vector<8x8xf32>, vector<8x4xf32>, vector<8x4xf32> -> vector<8x4xf32>
    %c2_66 = arith.constant 2 : index
    %c0_67 = arith.constant 0 : index
    %c0_68 = arith.constant 0 : index
    %106 = vector.load %arg9[%c2_66, %c0_67, %c0_68] : memref<8x8x4xf32, #tpu.memory_space<vmem>>, vector<1x8x4xf32>
    %107 = vector.shape_cast %106 : vector<1x8x4xf32> to vector<8x4xf32>
    %108 = vector.broadcast %91 : vector<8x1xf32> to vector<8x4xf32>
    %109 = arith.mulf %108, %107 : vector<8x4xf32>
    %110 = arith.addf %109, %105 : vector<8x4xf32>
    %c2_69 = arith.constant 2 : index
    %c0_70 = arith.constant 0 : index
    %c0_71 = arith.constant 0 : index
    %111 = vector.load %arg9[%c2_69, %c0_70, %c0_71] : memref<8x8x4xf32, #tpu.memory_space<vmem>>, vector<1x8x4xf32>
    %112 = vector.shape_cast %111 : vector<1x8x4xf32> to vector<8x4xf32>
    %113 = vector.shape_cast %110 : vector<8x4xf32> to vector<1x8x4xf32>
    tpu.vector_store %arg9[%c2_69, %c0_70, %c0_71], %113 {strides = array<i32>} : memref<8x8x4xf32, #tpu.memory_space<vmem>>, vector<1x8x4xf32>,
    %114 = vector.extract_strided_slice %4 {offsets = [0, 12], sizes = [8, 4], strides = [1, 1]} : vector<8x32xf32> to vector<8x4xf32>
    %115 = vector.extract_strided_slice %6 {offsets = [0, 12], sizes = [8, 4], strides = [1, 1]} : vector<8x32xf32> to vector<8x4xf32>
    %116 = vector.extract_strided_slice %8 {offsets = [0, 12], sizes = [8, 4], strides = [1, 1]} : vector<8x32xf32> to vector<8x4xf32>
    %cst_72 = arith.constant dense<0.000000e+00> : vector<8x8xf32>
    %117 = tpu.matmul %114, %115, %cst_72 {dimension_numbers = #tpu.dot_dimension_numbers<[1], [1], [0], [0], [0, 0, 1, 0], [], []>} : vector<8x4xf32>, vector<8x4xf32>, vector<8x8xf32> -> vector<8x8xf32>
    %c3 = arith.constant 3 : index
    %c0_73 = arith.constant 0 : index
    %c0_74 = arith.constant 0 : index
    %118 = vector.load %arg7[%c3, %c0_73, %c0_74] : memref<8x8x1xf32, #tpu.memory_space<vmem>>, vector<1x8x1xf32>
    %119 = vector.shape_cast %118 : vector<1x8x1xf32> to vector<8x1xf32>
    %c3_75 = arith.constant 3 : index
    %c0_76 = arith.constant 0 : index
    %c0_77 = arith.constant 0 : index
    %120 = vector.load %arg8[%c3_75, %c0_76, %c0_77] : memref<8x8x1xf32, #tpu.memory_space<vmem>>, vector<1x8x1xf32>
    %121 = vector.shape_cast %120 : vector<1x8x1xf32> to vector<8x1xf32>
    %cst_78 = arith.constant dense<0xFF800000> : vector<8xf32>
    %122 = vector.multi_reduction <maximumf>, %117, %cst_78 [1] : vector<8x8xf32> to vector<8xf32>
    %123 = vector.shape_cast %122 : vector<8xf32> to vector<8x1xf32>
    %124 = arith.maximumf %119, %123 : vector<8x1xf32>
    %125 = arith.subf %119, %124 : vector<8x1xf32>
    %126 = math.exp %125 : vector<8x1xf32>
    %127 = vector.broadcast %124 : vector<8x1xf32> to vector<8x8xf32>
    %128 = arith.subf %117, %127 : vector<8x8xf32>
    %129 = math.exp %128 : vector<8x8xf32>
    %130 = arith.mulf %126, %121 : vector<8x1xf32>
    %cst_79 = arith.constant dense<0.000000e+00> : vector<8xf32>
    %131 = vector.multi_reduction <add>, %129, %cst_79 [1] : vector<8x8xf32> to vector<8xf32>
    %132 = vector.shape_cast %131 : vector<8xf32> to vector<8x1xf32>
    %133 = arith.addf %130, %132 : vector<8x1xf32>
    %c3_80 = arith.constant 3 : index
    %c0_81 = arith.constant 0 : index
    %c0_82 = arith.constant 0 : index
    %134 = vector.load %arg8[%c3_80, %c0_81, %c0_82] : memref<8x8x1xf32, #tpu.memory_space<vmem>>, vector<1x8x1xf32>
    %135 = vector.shape_cast %134 : vector<1x8x1xf32> to vector<8x1xf32>
    %136 = vector.shape_cast %133 : vector<8x1xf32> to vector<1x8x1xf32>
    tpu.vector_store %arg8[%c3_80, %c0_81, %c0_82], %136 {strides = array<i32>} : memref<8x8x1xf32, #tpu.memory_space<vmem>>, vector<1x8x1xf32>,
    %c3_83 = arith.constant 3 : index
    %c0_84 = arith.constant 0 : index
    %c0_85 = arith.constant 0 : index
    %137 = vector.load %arg7[%c3_83, %c0_84, %c0_85] : memref<8x8x1xf32, #tpu.memory_space<vmem>>, vector<1x8x1xf32>
    %138 = vector.shape_cast %137 : vector<1x8x1xf32> to vector<8x1xf32>
    %139 = vector.shape_cast %124 : vector<8x1xf32> to vector<1x8x1xf32>
    tpu.vector_store %arg7[%c3_83, %c0_84, %c0_85], %139 {strides = array<i32>} : memref<8x8x1xf32, #tpu.memory_space<vmem>>, vector<1x8x1xf32>,
    %cst_86 = arith.constant dense<0.000000e+00> : vector<8x4xf32>
    %140 = tpu.matmul %129, %116, %cst_86 {dimension_numbers = #tpu.dot_dimension_numbers<[1], [0], [0], [1], [0, 0, 1, 1], [], []>} : vector<8x8xf32>, vector<8x4xf32>, vector<8x4xf32> -> vector<8x4xf32>
    %c3_87 = arith.constant 3 : index
    %c0_88 = arith.constant 0 : index
    %c0_89 = arith.constant 0 : index
    %141 = vector.load %arg9[%c3_87, %c0_88, %c0_89] : memref<8x8x4xf32, #tpu.memory_space<vmem>>, vector<1x8x4xf32>
    %142 = vector.shape_cast %141 : vector<1x8x4xf32> to vector<8x4xf32>
    %143 = vector.broadcast %126 : vector<8x1xf32> to vector<8x4xf32>
    %144 = arith.mulf %143, %142 : vector<8x4xf32>
    %145 = arith.addf %144, %140 : vector<8x4xf32>
    %c3_90 = arith.constant 3 : index
    %c0_91 = arith.constant 0 : index
    %c0_92 = arith.constant 0 : index
    %146 = vector.load %arg9[%c3_90, %c0_91, %c0_92] : memref<8x8x4xf32, #tpu.memory_space<vmem>>, vector<1x8x4xf32>
    %147 = vector.shape_cast %146 : vector<1x8x4xf32> to vector<8x4xf32>
    %148 = vector.shape_cast %145 : vector<8x4xf32> to vector<1x8x4xf32>
    tpu.vector_store %arg9[%c3_90, %c0_91, %c0_92], %148 {strides = array<i32>} : memref<8x8x4xf32, #tpu.memory_space<vmem>>, vector<1x8x4xf32>,
    %149 = vector.extract_strided_slice %4 {offsets = [0, 16], sizes = [8, 4], strides = [1, 1]} : vector<8x32xf32> to vector<8x4xf32>
    %150 = vector.extract_strided_slice %6 {offsets = [0, 16], sizes = [8, 4], strides = [1, 1]} : vector<8x32xf32> to vector<8x4xf32>
    %151 = vector.extract_strided_slice %8 {offsets = [0, 16], sizes = [8, 4], strides = [1, 1]} : vector<8x32xf32> to vector<8x4xf32>
    %cst_93 = arith.constant dense<0.000000e+00> : vector<8x8xf32>
    %152 = tpu.matmul %149, %150, %cst_93 {dimension_numbers = #tpu.dot_dimension_numbers<[1], [1], [0], [0], [0, 0, 1, 0], [], []>} : vector<8x4xf32>, vector<8x4xf32>, vector<8x8xf32> -> vector<8x8xf32>
    %c4 = arith.constant 4 : index
    %c0_94 = arith.constant 0 : index
    %c0_95 = arith.constant 0 : index
    %153 = vector.load %arg7[%c4, %c0_94, %c0_95] : memref<8x8x1xf32, #tpu.memory_space<vmem>>, vector<1x8x1xf32>
    %154 = vector.shape_cast %153 : vector<1x8x1xf32> to vector<8x1xf32>
    %c4_96 = arith.constant 4 : index
    %c0_97 = arith.constant 0 : index
    %c0_98 = arith.constant 0 : index
    %155 = vector.load %arg8[%c4_96, %c0_97, %c0_98] : memref<8x8x1xf32, #tpu.memory_space<vmem>>, vector<1x8x1xf32>
    %156 = vector.shape_cast %155 : vector<1x8x1xf32> to vector<8x1xf32>
    %cst_99 = arith.constant dense<0xFF800000> : vector<8xf32>
    %157 = vector.multi_reduction <maximumf>, %152, %cst_99 [1] : vector<8x8xf32> to vector<8xf32>
    %158 = vector.shape_cast %157 : vector<8xf32> to vector<8x1xf32>
    %159 = arith.maximumf %154, %158 : vector<8x1xf32>
    %160 = arith.subf %154, %159 : vector<8x1xf32>
    %161 = math.exp %160 : vector<8x1xf32>
    %162 = vector.broadcast %159 : vector<8x1xf32> to vector<8x8xf32>
    %163 = arith.subf %152, %162 : vector<8x8xf32>
    %164 = math.exp %163 : vector<8x8xf32>
    %165 = arith.mulf %161, %156 : vector<8x1xf32>
    %cst_100 = arith.constant dense<0.000000e+00> : vector<8xf32>
    %166 = vector.multi_reduction <add>, %164, %cst_100 [1] : vector<8x8xf32> to vector<8xf32>
    %167 = vector.shape_cast %166 : vector<8xf32> to vector<8x1xf32>
    %168 = arith.addf %165, %167 : vector<8x1xf32>
    %c4_101 = arith.constant 4 : index
    %c0_102 = arith.constant 0 : index
    %c0_103 = arith.constant 0 : index
    %169 = vector.load %arg8[%c4_101, %c0_102, %c0_103] : memref<8x8x1xf32, #tpu.memory_space<vmem>>, vector<1x8x1xf32>
    %170 = vector.shape_cast %169 : vector<1x8x1xf32> to vector<8x1xf32>
    %171 = vector.shape_cast %168 : vector<8x1xf32> to vector<1x8x1xf32>
    tpu.vector_store %arg8[%c4_101, %c0_102, %c0_103], %171 {strides = array<i32>} : memref<8x8x1xf32, #tpu.memory_space<vmem>>, vector<1x8x1xf32>,
    %c4_104 = arith.constant 4 : index
    %c0_105 = arith.constant 0 : index
    %c0_106 = arith.constant 0 : index
    %172 = vector.load %arg7[%c4_104, %c0_105, %c0_106] : memref<8x8x1xf32, #tpu.memory_space<vmem>>, vector<1x8x1xf32>
    %173 = vector.shape_cast %172 : vector<1x8x1xf32> to vector<8x1xf32>
    %174 = vector.shape_cast %159 : vector<8x1xf32> to vector<1x8x1xf32>
    tpu.vector_store %arg7[%c4_104, %c0_105, %c0_106], %174 {strides = array<i32>} : memref<8x8x1xf32, #tpu.memory_space<vmem>>, vector<1x8x1xf32>,
    %cst_107 = arith.constant dense<0.000000e+00> : vector<8x4xf32>
    %175 = tpu.matmul %164, %151, %cst_107 {dimension_numbers = #tpu.dot_dimension_numbers<[1], [0], [0], [1], [0, 0, 1, 1], [], []>} : vector<8x8xf32>, vector<8x4xf32>, vector<8x4xf32> -> vector<8x4xf32>
    %c4_108 = arith.constant 4 : index
    %c0_109 = arith.constant 0 : index
    %c0_110 = arith.constant 0 : index
    %176 = vector.load %arg9[%c4_108, %c0_109, %c0_110] : memref<8x8x4xf32, #tpu.memory_space<vmem>>, vector<1x8x4xf32>
    %177 = vector.shape_cast %176 : vector<1x8x4xf32> to vector<8x4xf32>
    %178 = vector.broadcast %161 : vector<8x1xf32> to vector<8x4xf32>
    %179 = arith.mulf %178, %177 : vector<8x4xf32>
    %180 = arith.addf %179, %175 : vector<8x4xf32>
    %c4_111 = arith.constant 4 : index
    %c0_112 = arith.constant 0 : index
    %c0_113 = arith.constant 0 : index
    %181 = vector.load %arg9[%c4_111, %c0_112, %c0_113] : memref<8x8x4xf32, #tpu.memory_space<vmem>>, vector<1x8x4xf32>
    %182 = vector.shape_cast %181 : vector<1x8x4xf32> to vector<8x4xf32>
    %183 = vector.shape_cast %180 : vector<8x4xf32> to vector<1x8x4xf32>
    tpu.vector_store %arg9[%c4_111, %c0_112, %c0_113], %183 {strides = array<i32>} : memref<8x8x4xf32, #tpu.memory_space<vmem>>, vector<1x8x4xf32>,
    %184 = vector.extract_strided_slice %4 {offsets = [0, 20], sizes = [8, 4], strides = [1, 1]} : vector<8x32xf32> to vector<8x4xf32>
    %185 = vector.extract_strided_slice %6 {offsets = [0, 20], sizes = [8, 4], strides = [1, 1]} : vector<8x32xf32> to vector<8x4xf32>
    %186 = vector.extract_strided_slice %8 {offsets = [0, 20], sizes = [8, 4], strides = [1, 1]} : vector<8x32xf32> to vector<8x4xf32>
    %cst_114 = arith.constant dense<0.000000e+00> : vector<8x8xf32>
    %187 = tpu.matmul %184, %185, %cst_114 {dimension_numbers = #tpu.dot_dimension_numbers<[1], [1], [0], [0], [0, 0, 1, 0], [], []>} : vector<8x4xf32>, vector<8x4xf32>, vector<8x8xf32> -> vector<8x8xf32>
    %c5 = arith.constant 5 : index
    %c0_115 = arith.constant 0 : index
    %c0_116 = arith.constant 0 : index
    %188 = vector.load %arg7[%c5, %c0_115, %c0_116] : memref<8x8x1xf32, #tpu.memory_space<vmem>>, vector<1x8x1xf32>
    %189 = vector.shape_cast %188 : vector<1x8x1xf32> to vector<8x1xf32>
    %c5_117 = arith.constant 5 : index
    %c0_118 = arith.constant 0 : index
    %c0_119 = arith.constant 0 : index
    %190 = vector.load %arg8[%c5_117, %c0_118, %c0_119] : memref<8x8x1xf32, #tpu.memory_space<vmem>>, vector<1x8x1xf32>
    %191 = vector.shape_cast %190 : vector<1x8x1xf32> to vector<8x1xf32>
    %cst_120 = arith.constant dense<0xFF800000> : vector<8xf32>
    %192 = vector.multi_reduction <maximumf>, %187, %cst_120 [1] : vector<8x8xf32> to vector<8xf32>
    %193 = vector.shape_cast %192 : vector<8xf32> to vector<8x1xf32>
    %194 = arith.maximumf %189, %193 : vector<8x1xf32>
    %195 = arith.subf %189, %194 : vector<8x1xf32>
    %196 = math.exp %195 : vector<8x1xf32>
    %197 = vector.broadcast %194 : vector<8x1xf32> to vector<8x8xf32>
    %198 = arith.subf %187, %197 : vector<8x8xf32>
    %199 = math.exp %198 : vector<8x8xf32>
    %200 = arith.mulf %196, %191 : vector<8x1xf32>
    %cst_121 = arith.constant dense<0.000000e+00> : vector<8xf32>
    %201 = vector.multi_reduction <add>, %199, %cst_121 [1] : vector<8x8xf32> to vector<8xf32>
    %202 = vector.shape_cast %201 : vector<8xf32> to vector<8x1xf32>
    %203 = arith.addf %200, %202 : vector<8x1xf32>
    %c5_122 = arith.constant 5 : index
    %c0_123 = arith.constant 0 : index
    %c0_124 = arith.constant 0 : index
    %204 = vector.load %arg8[%c5_122, %c0_123, %c0_124] : memref<8x8x1xf32, #tpu.memory_space<vmem>>, vector<1x8x1xf32>
    %205 = vector.shape_cast %204 : vector<1x8x1xf32> to vector<8x1xf32>
    %206 = vector.shape_cast %203 : vector<8x1xf32> to vector<1x8x1xf32>
    tpu.vector_store %arg8[%c5_122, %c0_123, %c0_124], %206 {strides = array<i32>} : memref<8x8x1xf32, #tpu.memory_space<vmem>>, vector<1x8x1xf32>,
    %c5_125 = arith.constant 5 : index
    %c0_126 = arith.constant 0 : index
    %c0_127 = arith.constant 0 : index
    %207 = vector.load %arg7[%c5_125, %c0_126, %c0_127] : memref<8x8x1xf32, #tpu.memory_space<vmem>>, vector<1x8x1xf32>
    %208 = vector.shape_cast %207 : vector<1x8x1xf32> to vector<8x1xf32>
    %209 = vector.shape_cast %194 : vector<8x1xf32> to vector<1x8x1xf32>
    tpu.vector_store %arg7[%c5_125, %c0_126, %c0_127], %209 {strides = array<i32>} : memref<8x8x1xf32, #tpu.memory_space<vmem>>, vector<1x8x1xf32>,
    %cst_128 = arith.constant dense<0.000000e+00> : vector<8x4xf32>
    %210 = tpu.matmul %199, %186, %cst_128 {dimension_numbers = #tpu.dot_dimension_numbers<[1], [0], [0], [1], [0, 0, 1, 1], [], []>} : vector<8x8xf32>, vector<8x4xf32>, vector<8x4xf32> -> vector<8x4xf32>
    %c5_129 = arith.constant 5 : index
    %c0_130 = arith.constant 0 : index
    %c0_131 = arith.constant 0 : index
    %211 = vector.load %arg9[%c5_129, %c0_130, %c0_131] : memref<8x8x4xf32, #tpu.memory_space<vmem>>, vector<1x8x4xf32>
    %212 = vector.shape_cast %211 : vector<1x8x4xf32> to vector<8x4xf32>
    %213 = vector.broadcast %196 : vector<8x1xf32> to vector<8x4xf32>
    %214 = arith.mulf %213, %212 : vector<8x4xf32>
    %215 = arith.addf %214, %210 : vector<8x4xf32>
    %c5_132 = arith.constant 5 : index
    %c0_133 = arith.constant 0 : index
    %c0_134 = arith.constant 0 : index
    %216 = vector.load %arg9[%c5_132, %c0_133, %c0_134] : memref<8x8x4xf32, #tpu.memory_space<vmem>>, vector<1x8x4xf32>
    %217 = vector.shape_cast %216 : vector<1x8x4xf32> to vector<8x4xf32>
    %218 = vector.shape_cast %215 : vector<8x4xf32> to vector<1x8x4xf32>
    tpu.vector_store %arg9[%c5_132, %c0_133, %c0_134], %218 {strides = array<i32>} : memref<8x8x4xf32, #tpu.memory_space<vmem>>, vector<1x8x4xf32>,
    %219 = vector.extract_strided_slice %4 {offsets = [0, 24], sizes = [8, 4], strides = [1, 1]} : vector<8x32xf32> to vector<8x4xf32>
    %220 = vector.extract_strided_slice %6 {offsets = [0, 24], sizes = [8, 4], strides = [1, 1]} : vector<8x32xf32> to vector<8x4xf32>
    %221 = vector.extract_strided_slice %8 {offsets = [0, 24], sizes = [8, 4], strides = [1, 1]} : vector<8x32xf32> to vector<8x4xf32>
    %cst_135 = arith.constant dense<0.000000e+00> : vector<8x8xf32>
    %222 = tpu.matmul %219, %220, %cst_135 {dimension_numbers = #tpu.dot_dimension_numbers<[1], [1], [0], [0], [0, 0, 1, 0], [], []>} : vector<8x4xf32>, vector<8x4xf32>, vector<8x8xf32> -> vector<8x8xf32>
    %c6 = arith.constant 6 : index
    %c0_136 = arith.constant 0 : index
    %c0_137 = arith.constant 0 : index
    %223 = vector.load %arg7[%c6, %c0_136, %c0_137] : memref<8x8x1xf32, #tpu.memory_space<vmem>>, vector<1x8x1xf32>
    %224 = vector.shape_cast %223 : vector<1x8x1xf32> to vector<8x1xf32>
    %c6_138 = arith.constant 6 : index
    %c0_139 = arith.constant 0 : index
    %c0_140 = arith.constant 0 : index
    %225 = vector.load %arg8[%c6_138, %c0_139, %c0_140] : memref<8x8x1xf32, #tpu.memory_space<vmem>>, vector<1x8x1xf32>
    %226 = vector.shape_cast %225 : vector<1x8x1xf32> to vector<8x1xf32>
    %cst_141 = arith.constant dense<0xFF800000> : vector<8xf32>
    %227 = vector.multi_reduction <maximumf>, %222, %cst_141 [1] : vector<8x8xf32> to vector<8xf32>
    %228 = vector.shape_cast %227 : vector<8xf32> to vector<8x1xf32>
    %229 = arith.maximumf %224, %228 : vector<8x1xf32>
    %230 = arith.subf %224, %229 : vector<8x1xf32>
    %231 = math.exp %230 : vector<8x1xf32>
    %232 = vector.broadcast %229 : vector<8x1xf32> to vector<8x8xf32>
    %233 = arith.subf %222, %232 : vector<8x8xf32>
    %234 = math.exp %233 : vector<8x8xf32>
    %235 = arith.mulf %231, %226 : vector<8x1xf32>
    %cst_142 = arith.constant dense<0.000000e+00> : vector<8xf32>
    %236 = vector.multi_reduction <add>, %234, %cst_142 [1] : vector<8x8xf32> to vector<8xf32>
    %237 = vector.shape_cast %236 : vector<8xf32> to vector<8x1xf32>
    %238 = arith.addf %235, %237 : vector<8x1xf32>
    %c6_143 = arith.constant 6 : index
    %c0_144 = arith.constant 0 : index
    %c0_145 = arith.constant 0 : index
    %239 = vector.load %arg8[%c6_143, %c0_144, %c0_145] : memref<8x8x1xf32, #tpu.memory_space<vmem>>, vector<1x8x1xf32>
    %240 = vector.shape_cast %239 : vector<1x8x1xf32> to vector<8x1xf32>
    %241 = vector.shape_cast %238 : vector<8x1xf32> to vector<1x8x1xf32>
    tpu.vector_store %arg8[%c6_143, %c0_144, %c0_145], %241 {strides = array<i32>} : memref<8x8x1xf32, #tpu.memory_space<vmem>>, vector<1x8x1xf32>,
    %c6_146 = arith.constant 6 : index
    %c0_147 = arith.constant 0 : index
    %c0_148 = arith.constant 0 : index
    %242 = vector.load %arg7[%c6_146, %c0_147, %c0_148] : memref<8x8x1xf32, #tpu.memory_space<vmem>>, vector<1x8x1xf32>
    %243 = vector.shape_cast %242 : vector<1x8x1xf32> to vector<8x1xf32>
    %244 = vector.shape_cast %229 : vector<8x1xf32> to vector<1x8x1xf32>
    tpu.vector_store %arg7[%c6_146, %c0_147, %c0_148], %244 {strides = array<i32>} : memref<8x8x1xf32, #tpu.memory_space<vmem>>, vector<1x8x1xf32>,
    %cst_149 = arith.constant dense<0.000000e+00> : vector<8x4xf32>
    %245 = tpu.matmul %234, %221, %cst_149 {dimension_numbers = #tpu.dot_dimension_numbers<[1], [0], [0], [1], [0, 0, 1, 1], [], []>} : vector<8x8xf32>, vector<8x4xf32>, vector<8x4xf32> -> vector<8x4xf32>
    %c6_150 = arith.constant 6 : index
    %c0_151 = arith.constant 0 : index
    %c0_152 = arith.constant 0 : index
    %246 = vector.load %arg9[%c6_150, %c0_151, %c0_152] : memref<8x8x4xf32, #tpu.memory_space<vmem>>, vector<1x8x4xf32>
    %247 = vector.shape_cast %246 : vector<1x8x4xf32> to vector<8x4xf32>
    %248 = vector.broadcast %231 : vector<8x1xf32> to vector<8x4xf32>
    %249 = arith.mulf %248, %247 : vector<8x4xf32>
    %250 = arith.addf %249, %245 : vector<8x4xf32>
    %c6_153 = arith.constant 6 : index
    %c0_154 = arith.constant 0 : index
    %c0_155 = arith.constant 0 : index
    %251 = vector.load %arg9[%c6_153, %c0_154, %c0_155] : memref<8x8x4xf32, #tpu.memory_space<vmem>>, vector<1x8x4xf32>
    %252 = vector.shape_cast %251 : vector<1x8x4xf32> to vector<8x4xf32>
    %253 = vector.shape_cast %250 : vector<8x4xf32> to vector<1x8x4xf32>
    tpu.vector_store %arg9[%c6_153, %c0_154, %c0_155], %253 {strides = array<i32>} : memref<8x8x4xf32, #tpu.memory_space<vmem>>, vector<1x8x4xf32>,
    %254 = vector.extract_strided_slice %4 {offsets = [0, 28], sizes = [8, 4], strides = [1, 1]} : vector<8x32xf32> to vector<8x4xf32>
    %255 = vector.extract_strided_slice %6 {offsets = [0, 28], sizes = [8, 4], strides = [1, 1]} : vector<8x32xf32> to vector<8x4xf32>
    %256 = vector.extract_strided_slice %8 {offsets = [0, 28], sizes = [8, 4], strides = [1, 1]} : vector<8x32xf32> to vector<8x4xf32>
    %cst_156 = arith.constant dense<0.000000e+00> : vector<8x8xf32>
    %257 = tpu.matmul %254, %255, %cst_156 {dimension_numbers = #tpu.dot_dimension_numbers<[1], [1], [0], [0], [0, 0, 1, 0], [], []>} : vector<8x4xf32>, vector<8x4xf32>, vector<8x8xf32> -> vector<8x8xf32>
    %c7 = arith.constant 7 : index
    %c0_157 = arith.constant 0 : index
    %c0_158 = arith.constant 0 : index
    %258 = vector.load %arg7[%c7, %c0_157, %c0_158] : memref<8x8x1xf32, #tpu.memory_space<vmem>>, vector<1x8x1xf32>
    %259 = vector.shape_cast %258 : vector<1x8x1xf32> to vector<8x1xf32>
    %c7_159 = arith.constant 7 : index
    %c0_160 = arith.constant 0 : index
    %c0_161 = arith.constant 0 : index
    %260 = vector.load %arg8[%c7_159, %c0_160, %c0_161] : memref<8x8x1xf32, #tpu.memory_space<vmem>>, vector<1x8x1xf32>
    %261 = vector.shape_cast %260 : vector<1x8x1xf32> to vector<8x1xf32>
    %cst_162 = arith.constant dense<0xFF800000> : vector<8xf32>
    %262 = vector.multi_reduction <maximumf>, %257, %cst_162 [1] : vector<8x8xf32> to vector<8xf32>
    %263 = vector.shape_cast %262 : vector<8xf32> to vector<8x1xf32>
    %264 = arith.maximumf %259, %263 : vector<8x1xf32>
    %265 = arith.subf %259, %264 : vector<8x1xf32>
    %266 = math.exp %265 : vector<8x1xf32>
    %267 = vector.broadcast %264 : vector<8x1xf32> to vector<8x8xf32>
    %268 = arith.subf %257, %267 : vector<8x8xf32>
    %269 = math.exp %268 : vector<8x8xf32>
    %270 = arith.mulf %266, %261 : vector<8x1xf32>
    %cst_163 = arith.constant dense<0.000000e+00> : vector<8xf32>
    %271 = vector.multi_reduction <add>, %269, %cst_163 [1] : vector<8x8xf32> to vector<8xf32>
    %272 = vector.shape_cast %271 : vector<8xf32> to vector<8x1xf32>
    %273 = arith.addf %270, %272 : vector<8x1xf32>
    %c7_164 = arith.constant 7 : index
    %c0_165 = arith.constant 0 : index
    %c0_166 = arith.constant 0 : index
    %274 = vector.load %arg8[%c7_164, %c0_165, %c0_166] : memref<8x8x1xf32, #tpu.memory_space<vmem>>, vector<1x8x1xf32>
    %275 = vector.shape_cast %274 : vector<1x8x1xf32> to vector<8x1xf32>
    %276 = vector.shape_cast %273 : vector<8x1xf32> to vector<1x8x1xf32>
    tpu.vector_store %arg8[%c7_164, %c0_165, %c0_166], %276 {strides = array<i32>} : memref<8x8x1xf32, #tpu.memory_space<vmem>>, vector<1x8x1xf32>,
    %c7_167 = arith.constant 7 : index
    %c0_168 = arith.constant 0 : index
    %c0_169 = arith.constant 0 : index
    %277 = vector.load %arg7[%c7_167, %c0_168, %c0_169] : memref<8x8x1xf32, #tpu.memory_space<vmem>>, vector<1x8x1xf32>
    %278 = vector.shape_cast %277 : vector<1x8x1xf32> to vector<8x1xf32>
    %279 = vector.shape_cast %264 : vector<8x1xf32> to vector<1x8x1xf32>
    tpu.vector_store %arg7[%c7_167, %c0_168, %c0_169], %279 {strides = array<i32>} : memref<8x8x1xf32, #tpu.memory_space<vmem>>, vector<1x8x1xf32>,
    %cst_170 = arith.constant dense<0.000000e+00> : vector<8x4xf32>
    %280 = tpu.matmul %269, %256, %cst_170 {dimension_numbers = #tpu.dot_dimension_numbers<[1], [0], [0], [1], [0, 0, 1, 1], [], []>} : vector<8x8xf32>, vector<8x4xf32>, vector<8x4xf32> -> vector<8x4xf32>
    %c7_171 = arith.constant 7 : index
    %c0_172 = arith.constant 0 : index
    %c0_173 = arith.constant 0 : index
    %281 = vector.load %arg9[%c7_171, %c0_172, %c0_173] : memref<8x8x4xf32, #tpu.memory_space<vmem>>, vector<1x8x4xf32>
    %282 = vector.shape_cast %281 : vector<1x8x4xf32> to vector<8x4xf32>
    %283 = vector.broadcast %266 : vector<8x1xf32> to vector<8x4xf32>
    %284 = arith.mulf %283, %282 : vector<8x4xf32>
    %285 = arith.addf %284, %280 : vector<8x4xf32>
    %c7_174 = arith.constant 7 : index
    %c0_175 = arith.constant 0 : index
    %c0_176 = arith.constant 0 : index
    %286 = vector.load %arg9[%c7_174, %c0_175, %c0_176] : memref<8x8x4xf32, #tpu.memory_space<vmem>>, vector<1x8x4xf32>
    %287 = vector.shape_cast %286 : vector<1x8x4xf32> to vector<8x4xf32>
    %288 = vector.shape_cast %285 : vector<8x4xf32> to vector<1x8x4xf32>
    tpu.vector_store %arg9[%c7_174, %c0_175, %c0_176], %288 {strides = array<i32>} : memref<8x8x4xf32, #tpu.memory_space<vmem>>, vector<1x8x4xf32>,
    %c0_i32_177 = arith.constant 0 : i32
    %289 = arith.cmpi eq, %arg2, %c0_i32_177 : i32
    %290 = arith.extui %289 : i1 to i32
    %c0_i32_178 = arith.constant 0 : i32
    %291 = arith.cmpi ne, %290, %c0_i32_178 : i32
    scf.if %291 {
      %c0_179 = arith.constant 0 : index
      %c0_180 = arith.constant 0 : index
      %c0_181 = arith.constant 0 : index
      %292 = vector.load %arg8[%c0_179, %c0_180, %c0_181] : memref<8x8x1xf32, #tpu.memory_space<vmem>>, vector<1x8x1xf32>
      %293 = vector.shape_cast %292 : vector<1x8x1xf32> to vector<8x1xf32>
      %294 = tpu.reciprocal %293 : vector<8x1xf32> -> vector<8x1xf32>
      %c0_182 = arith.constant 0 : index
      %c0_183 = arith.constant 0 : index
      %c0_184 = arith.constant 0 : index
      %295 = vector.load %arg9[%c0_182, %c0_183, %c0_184] : memref<8x8x4xf32, #tpu.memory_space<vmem>>, vector<1x8x4xf32>
      %296 = vector.shape_cast %295 : vector<1x8x4xf32> to vector<8x4xf32>
      %297 = vector.broadcast %294 : vector<8x1xf32> to vector<8x4xf32>
      %298 = arith.mulf %296, %297 : vector<8x4xf32>
      %c1_185 = arith.constant 1 : index
      %c0_186 = arith.constant 0 : index
      %c0_187 = arith.constant 0 : index
      %299 = vector.load %arg8[%c1_185, %c0_186, %c0_187] : memref<8x8x1xf32, #tpu.memory_space<vmem>>, vector<1x8x1xf32>
      %300 = vector.shape_cast %299 : vector<1x8x1xf32> to vector<8x1xf32>
      %301 = tpu.reciprocal %300 : vector<8x1xf32> -> vector<8x1xf32>
      %c1_188 = arith.constant 1 : index
      %c0_189 = arith.constant 0 : index
      %c0_190 = arith.constant 0 : index
      %302 = vector.load %arg9[%c1_188, %c0_189, %c0_190] : memref<8x8x4xf32, #tpu.memory_space<vmem>>, vector<1x8x4xf32>
      %303 = vector.shape_cast %302 : vector<1x8x4xf32> to vector<8x4xf32>
      %304 = vector.broadcast %301 : vector<8x1xf32> to vector<8x4xf32>
      %305 = arith.mulf %303, %304 : vector<8x4xf32>
      %c2_191 = arith.constant 2 : index
      %c0_192 = arith.constant 0 : index
      %c0_193 = arith.constant 0 : index
      %306 = vector.load %arg8[%c2_191, %c0_192, %c0_193] : memref<8x8x1xf32, #tpu.memory_space<vmem>>, vector<1x8x1xf32>
      %307 = vector.shape_cast %306 : vector<1x8x1xf32> to vector<8x1xf32>
      %308 = tpu.reciprocal %307 : vector<8x1xf32> -> vector<8x1xf32>
      %c2_194 = arith.constant 2 : index
      %c0_195 = arith.constant 0 : index
      %c0_196 = arith.constant 0 : index
      %309 = vector.load %arg9[%c2_194, %c0_195, %c0_196] : memref<8x8x4xf32, #tpu.memory_space<vmem>>, vector<1x8x4xf32>
      %310 = vector.shape_cast %309 : vector<1x8x4xf32> to vector<8x4xf32>
      %311 = vector.broadcast %308 : vector<8x1xf32> to vector<8x4xf32>
      %312 = arith.mulf %310, %311 : vector<8x4xf32>
      %c3_197 = arith.constant 3 : index
      %c0_198 = arith.constant 0 : index
      %c0_199 = arith.constant 0 : index
      %313 = vector.load %arg8[%c3_197, %c0_198, %c0_199] : memref<8x8x1xf32, #tpu.memory_space<vmem>>, vector<1x8x1xf32>
      %314 = vector.shape_cast %313 : vector<1x8x1xf32> to vector<8x1xf32>
      %315 = tpu.reciprocal %314 : vector<8x1xf32> -> vector<8x1xf32>
      %c3_200 = arith.constant 3 : index
      %c0_201 = arith.constant 0 : index
      %c0_202 = arith.constant 0 : index
      %316 = vector.load %arg9[%c3_200, %c0_201, %c0_202] : memref<8x8x4xf32, #tpu.memory_space<vmem>>, vector<1x8x4xf32>
      %317 = vector.shape_cast %316 : vector<1x8x4xf32> to vector<8x4xf32>
      %318 = vector.broadcast %315 : vector<8x1xf32> to vector<8x4xf32>
      %319 = arith.mulf %317, %318 : vector<8x4xf32>
      %c4_203 = arith.constant 4 : index
      %c0_204 = arith.constant 0 : index
      %c0_205 = arith.constant 0 : index
      %320 = vector.load %arg8[%c4_203, %c0_204, %c0_205] : memref<8x8x1xf32, #tpu.memory_space<vmem>>, vector<1x8x1xf32>
      %321 = vector.shape_cast %320 : vector<1x8x1xf32> to vector<8x1xf32>
      %322 = tpu.reciprocal %321 : vector<8x1xf32> -> vector<8x1xf32>
      %c4_206 = arith.constant 4 : index
      %c0_207 = arith.constant 0 : index
      %c0_208 = arith.constant 0 : index
      %323 = vector.load %arg9[%c4_206, %c0_207, %c0_208] : memref<8x8x4xf32, #tpu.memory_space<vmem>>, vector<1x8x4xf32>
      %324 = vector.shape_cast %323 : vector<1x8x4xf32> to vector<8x4xf32>
      %325 = vector.broadcast %322 : vector<8x1xf32> to vector<8x4xf32>
      %326 = arith.mulf %324, %325 : vector<8x4xf32>
      %c5_209 = arith.constant 5 : index
      %c0_210 = arith.constant 0 : index
      %c0_211 = arith.constant 0 : index
      %327 = vector.load %arg8[%c5_209, %c0_210, %c0_211] : memref<8x8x1xf32, #tpu.memory_space<vmem>>, vector<1x8x1xf32>
      %328 = vector.shape_cast %327 : vector<1x8x1xf32> to vector<8x1xf32>
      %329 = tpu.reciprocal %328 : vector<8x1xf32> -> vector<8x1xf32>
      %c5_212 = arith.constant 5 : index
      %c0_213 = arith.constant 0 : index
      %c0_214 = arith.constant 0 : index
      %330 = vector.load %arg9[%c5_212, %c0_213, %c0_214] : memref<8x8x4xf32, #tpu.memory_space<vmem>>, vector<1x8x4xf32>
      %331 = vector.shape_cast %330 : vector<1x8x4xf32> to vector<8x4xf32>
      %332 = vector.broadcast %329 : vector<8x1xf32> to vector<8x4xf32>
      %333 = arith.mulf %331, %332 : vector<8x4xf32>
      %c6_215 = arith.constant 6 : index
      %c0_216 = arith.constant 0 : index
      %c0_217 = arith.constant 0 : index
      %334 = vector.load %arg8[%c6_215, %c0_216, %c0_217] : memref<8x8x1xf32, #tpu.memory_space<vmem>>, vector<1x8x1xf32>
      %335 = vector.shape_cast %334 : vector<1x8x1xf32> to vector<8x1xf32>
      %336 = tpu.reciprocal %335 : vector<8x1xf32> -> vector<8x1xf32>
      %c6_218 = arith.constant 6 : index
      %c0_219 = arith.constant 0 : index
      %c0_220 = arith.constant 0 : index
      %337 = vector.load %arg9[%c6_218, %c0_219, %c0_220] : memref<8x8x4xf32, #tpu.memory_space<vmem>>, vector<1x8x4xf32>
      %338 = vector.shape_cast %337 : vector<1x8x4xf32> to vector<8x4xf32>
      %339 = vector.broadcast %336 : vector<8x1xf32> to vector<8x4xf32>
      %340 = arith.mulf %338, %339 : vector<8x4xf32>
      %c7_221 = arith.constant 7 : index
      %c0_222 = arith.constant 0 : index
      %c0_223 = arith.constant 0 : index
      %341 = vector.load %arg8[%c7_221, %c0_222, %c0_223] : memref<8x8x1xf32, #tpu.memory_space<vmem>>, vector<1x8x1xf32>
      %342 = vector.shape_cast %341 : vector<1x8x1xf32> to vector<8x1xf32>
      %343 = tpu.reciprocal %342 : vector<8x1xf32> -> vector<8x1xf32>
      %c7_224 = arith.constant 7 : index
      %c0_225 = arith.constant 0 : index
      %c0_226 = arith.constant 0 : index
      %344 = vector.load %arg9[%c7_224, %c0_225, %c0_226] : memref<8x8x4xf32, #tpu.memory_space<vmem>>, vector<1x8x4xf32>
      %345 = vector.shape_cast %344 : vector<1x8x4xf32> to vector<8x4xf32>
      %346 = vector.broadcast %343 : vector<8x1xf32> to vector<8x4xf32>
      %347 = arith.mulf %345, %346 : vector<8x4xf32>
      %348 = tpu.concatenate %298, %305, %312, %319, %326, %333, %340, %347 in 1 : vector<8x4xf32>, vector<8x4xf32>, vector<8x4xf32>, vector<8x4xf32>, vector<8x4xf32>, vector<8x4xf32>, vector<8x4xf32>, vector<8x4xf32> -> vector<8x32xf32>
      %c0_227 = arith.constant 0 : index
      %c0_228 = arith.constant 0 : index
      %c0_229 = arith.constant 0 : index
      %349 = vector.load %arg6[%c0_227, %c0_228, %c0_229] : memref<1x8x32xf32, #tpu.memory_space<vmem>>, vector<1x8x32xf32>
      %350 = vector.shape_cast %349 : vector<1x8x32xf32> to vector<8x32xf32>
      %351 = vector.shape_cast %348 : vector<8x32xf32> to vector<1x8x32xf32>
      tpu.vector_store %arg6[%c0_227, %c0_228, %c0_229], %351 {strides = array<i32>} : memref<1x8x32xf32, #tpu.memory_space<vmem>>, vector<1x8x32xf32>,
    } else {
    }
    return
  }
  func.func @transform_0(%arg0: i32, %arg1: i32, %arg2: i32) -> (i32, i32, i32) {
    %c0_i32 = arith.constant 0 : i32
    %c0_i32_0 = arith.constant 0 : i32
    return %arg0, %arg1, %c0_i32 : i32, i32, i32
  }
  func.func @transform_1(%arg0: i32, %arg1: i32, %arg2: i32) -> (i32, i32, i32) {
    %c0_i32 = arith.constant 0 : i32
    %c0_i32_0 = arith.constant 0 : i32
    return %arg0, %arg2, %c0_i32 : i32, i32, i32
  }
  func.func @transform_2(%arg0: i32, %arg1: i32, %arg2: i32) -> (i32, i32, i32) {
    %c0_i32 = arith.constant 0 : i32
    %c0_i32_0 = arith.constant 0 : i32
    return %arg0, %arg2, %c0_i32 : i32, i32, i32
  }
  func.func @transform_3(%arg0: i32, %arg1: i32, %arg2: i32) -> (i32, i32, i32) {
    %c0_i32 = arith.constant 0 : i32
    %c0_i32_0 = arith.constant 0 : i32
    return %arg0, %arg1, %c0_i32 : i32, i32, i32
  }
}

</mosaic_0001>

<bundles_post_ra>
// kernel: attention_forward.9
= control target key start
LH: loop header
LB: loop body
LE: loop exit
PB: predicated region body
PF: predicated region fallthrough
CT: control target
= control target key end

     0   :  { %vm19_vm0 = vcmask 261120   ;;  %v204_v6 = vmov 0.0   ;;  %s269_s0 = inlined_call_operand.vmem [shape: f32[16,32], index: 0, kind: input, shape index: {}]   ;;  %s270_s1 = inlined_call_operand.vmem [shape: f32[32,32], index: 1, kind: input, shape index: {}]   ;;  %s271_s2 = inlined_call_operand.vmem [shape: f32[1,32], index: 2, kind: input, shape index: {}]   ;;  %s272_s3 = inlined_call_operand.hbm [shape: f32[16,32], index: 3, kind: output, shape index: {}]  }
   0x1   :  { %v26_v0 = vld [vmem:[%s270_s1] sm:$0xff]  ;;  %v27_v1 = vld [vmem:[%s270_s1 + $0x8] sm:$0xff]  ;;  %v28_v2 = vld [vmem:[%s270_s1 + $0x10] sm:$0xff]  ;;  %21 = vst.msk [vmem:[#allocation2 + $0x8] sm:$0xff] %vm19_vm0, %v204_v6 }
   0x2   :  { %v168_v3 = vpack.c.bf16 %v27_v1, %v26_v0  ;;  %v29_v4 = vld [vmem:[%s270_s1 + $0x18] sm:$0xff]  ;;  %v24_v5 = vld [vmem:[%s269_s0] sm:$0xff]  ;;  %20 = vst.msk [vmem:[#allocation2] sm:$0xff] %vm19_vm0, %v204_v6 }
   0x3   :  { %v172_v7 = vpack.c.bf16 %v29_v4, %v28_v2  ;;  %165 = vmatprep.mubr.msk.f32.mxu0 %vm19_vm0, %v24_v5 }
   0x4   :  { %8 = vsyncpa [#allocation4], 0  ;;  %169 = vmatprep.subr.bf16.mxu0 %v168_v3  ;;  %v25_v8 = vld [vmem:[%s269_s0 + $0x8] sm:$0xff]  ;;  %v150_v15 = vld [vmem:[%s271_s2] ss:$0 sm:$0xff]  ;;  %s205_s25 = smov [#allocation3]  }
   0x5   :  { %171 = vmatpush3.bf16.msra.mxu0 %v168_v3  ;;  %s137_s26 = sshll.u32 %s205_s25, 4  ;;  %s138_s26 = int_to_ptr.vmem [resolvable:$true] %s137_s26 }
   0x6   :  { %173 = vmatprep.subr.bf16.mxu0 %v172_v7  ;;  %s180_s0 = scalar_lea.vmem %s138_s26, 256  ;;  %p185_p1 = scmp.lt.s32.totalorder %s138_s26, %s138_s26 }
   0x7   :  { %p181_p0 = scmp.ne.s32.totalorder %s138_s26, %s180_s0  ;;  %p186_p2 = scmp.lt.s32.totalorder %s180_s0, %s180_s0 }
   0x8   :  { %v23_v9 = vld [vmem:[#allocation2 + $0x8] sm:$0xff] }
   0x9   :  { %175 = vmatpush3.bf16.msra.mxu0 %v172_v7  ;;  %v22_v10 = vld [vmem:[#allocation2] sm:$0xff]  ;;  %p187_p3 = por %p186_p2, %p185_p1 }
   0xb   :  { %p188_p4 = pnand %p187_p3, %p181_p0 }
   0xc   :  { %166 = vmatmul.mubr.msk.f32.vlgmr.msra.gmra.mrb[0].mxu0 %vm19_vm0, %v25_v8 }
  0xdf   :  { %v167_v11 = vpop.f32.mrb[0].mxu0 }
  0xe0   :  { %v113_v12 = vadd.f32 %v167_v11, %v23_v9  ;;  %v103_v13 = vpop.f32.mrb[1].mxu0 }
  0xe1   :  { %v112_v14 = vadd.f32 %v103_v13, %v22_v10 }
  0xe2   :  { %115 = vst.msk [vmem:[#allocation2 + $0x8] sm:$0xff] %vm19_vm0, %v113_v12 }
  0xe3   :  { %114 = vst.msk [vmem:[#allocation2] sm:$0xff] %vm19_vm0, %v112_v14 }
  0xe9   :  { %v120_v16 = vld [vmem:[#allocation2 + $0x8] sm:$0xff] }
  0xea   :  { %v119_v17 = vld [vmem:[#allocation2] sm:$0xff]  ;;  %v129_v18 = vadd.f32 %v150_v15, %v120_v16 }
  0xeb   :  { %v128_v19 = vadd.f32 %v150_v15, %v119_v17 }
  0xec   :  { %131 = vst.msk [vmem:[#allocation3 + $0x8] sm:$0xff] %vm19_vm0, %v129_v18 }
  0xed   :  { %130 = vst.msk [vmem:[#allocation3] sm:$0xff] %vm19_vm0, %v128_v19 }
  0xee   :  { %191 = shalt.err (!%p188_p4)
}
  0xef   :  { %s192_s28 = scalar_lea.hbm %s272_s3, 256 }
  0xf0   :  { %p193_p5 = scmp.ne.s32.totalorder %s272_s3, %s192_s28  ;;  %p196_p6 = scmp.lt.u32.totalorder %s192_s28, %s272_s3 }
  0xf2   :  { %p198_p7 = pnand %p196_p6, %p193_p5 }
  0xf4   :  { %201 = shalt.err (!%p198_p7)
}
  0xf5   :  { %s206_s6 = smov 128   ;;  %s207_s7 = smov 8  }
  0xf6   :  { %143 = dma.vmem_to_hbm [thread:$0]  %s138_s26, 256, %s272_s3, [#allocation4], %s206_s6, %s206_s6, %s207_s7  }
  0xf7   :  { %202 = dma.done.wait [#allocation4], 256  }
  0xf8   :  { %203 = vsyncadd [#allocation4], 4294967040 }
  0xf9   :  { %147 = vsyncpa [#allocation4], 1 }

// kernel: attention_forward.7
= control target key start
LH: loop header
LB: loop body
LE: loop exit
PB: predicated region body
PF: predicated region fallthrough
CT: control target
= control target key end

     0   :  { %vm15_vm0 = vcmask 261120   ;;  %v151_v3 = vmov 0.0   ;;  %s199_s1 = inlined_call_operand.vmem [shape: f32[32,32], index: 1, kind: input, shape index: {}]   ;;  %s200_s0 = inlined_call_operand.vmem [shape: f32[16,32], index: 0, kind: input, shape index: {}]   ;;  %s201_s2 = inlined_call_operand.vmem [shape: f32[16,32], index: 2, kind: output, shape index: {}]  }
   0x1   :  { %v22_v0 = vld [vmem:[%s199_s1] sm:$0xff]  ;;  %v23_v1 = vld [vmem:[%s199_s1 + $0x8] sm:$0xff]  ;;  %v24_v2 = vld [vmem:[%s199_s1 + $0x10] sm:$0xff]  ;;  %17 = vst.msk [vmem:[#allocation2 + $0x8] sm:$0xff] %vm15_vm0, %v151_v3 }
   0x2   :  { %16 = vst.msk [vmem:[#allocation2] sm:$0xff] %vm15_vm0, %v151_v3  ;;  %v142_v4 = vpack.c.bf16 %v23_v1, %v22_v0  ;;  %v25_v5 = vld [vmem:[%s199_s1 + $0x18] sm:$0xff]  ;;  %v20_v6 = vld [vmem:[%s200_s0] sm:$0xff]  ;;  %v21_v8 = vld [vmem:[%s200_s0 + $0x8] sm:$0xff] }
   0x3   :  { %v146_v7 = vpack.c.bf16 %v25_v5, %v24_v2  ;;  %139 = vmatprep.mubr.msk.f32.mxu0 %vm15_vm0, %v20_v6 }
   0x4   :  { %143 = vmatprep.subr.bf16.mxu0 %v142_v4 }
   0x5   :  { %145 = vmatpush3.bf16.msra.mxu0 %v142_v4 }
   0x6   :  { %147 = vmatprep.subr.bf16.mxu0 %v146_v7 }
   0x8   :  { %v19_v9 = vld [vmem:[#allocation2 + $0x8] sm:$0xff] }
   0x9   :  { %149 = vmatpush3.bf16.msra.mxu0 %v146_v7  ;;  %v18_v10 = vld [vmem:[#allocation2] sm:$0xff] }
   0xc   :  { %140 = vmatmul.mubr.msk.f32.vlgmr.msra.gmra.mrb[0].mxu0 %vm15_vm0, %v21_v8 }
  0xdf   :  { %v141_v11 = vpop.f32.mrb[0].mxu0 }
  0xe0   :  { %v109_v12 = vadd.f32 %v141_v11, %v19_v9  ;;  %v99_v13 = vpop.f32.mrb[1].mxu0 }
  0xe1   :  { %v108_v14 = vadd.f32 %v99_v13, %v18_v10 }
  0xe2   :  { %111 = vst.msk [vmem:[#allocation2 + $0x8] sm:$0xff] %vm15_vm0, %v109_v12 }
  0xe3   :  { %110 = vst.msk [vmem:[#allocation2] sm:$0xff] %vm15_vm0, %v108_v14 }
  0xe9   :  { %v116_v15 = vld [vmem:[#allocation2 + $0x8] sm:$0xff] }
  0xea   :  { %118 = vst.msk [vmem:[%s201_s2 + $0x8] sm:$0xff] %vm15_vm0, %v116_v15  ;;  %v115_v16 = vld [vmem:[#allocation2] sm:$0xff] }
  0xeb   :  { %117 = vst.msk [vmem:[%s201_s2] sm:$0xff] %vm15_vm0, %v115_v16 }

// kernel: attention_forward.8
= control target key start
LH: loop header
LB: loop body
LE: loop exit
PB: predicated region body
PF: predicated region fallthrough
CT: control target
= control target key end

     0   :  { %s2334_s12 = smov 0   ;;  %s2336_s13 = smov 0   ;;  %s2682_s0 = inlined_call_operand.vmem [shape: f32[2,8,32], index: 0, kind: input, shape index: {}]   ;;  %s2683_s1 = inlined_call_operand.vmem [shape: f32[2,8,32], index: 1, kind: input, shape index: {}]   ;;  %s2684_s2 = inlined_call_operand.vmem [shape: f32[2,8,32], index: 2, kind: input, shape index: {}]   ;;  %s2685_s3 = inlined_call_operand.vmem [shape: f32[2,8,32], index: 3, kind: output, shape index: {}]  }
   0x1   :  { %s2338_s14 = smov 0  }
   0x2 LB: > { %s32_s15 = sadd.s32 1, %s2290_s13  ;;  %p2037_p0 = scmp.ge.s32.totalorder %s2294_s14, 1  ;;  %s2294_s14 = sphi %s2338_s14, %s13_s14   ;;  %s2290_s13 = sphi %s2336_s13, %s2687_s13   ;;  %s2286_s12 = sphi %s2334_s12, %s2686_s12  }
   0x3   : > { %p34_p1 = scmp.ge.s32.totalorder %s32_s15, 2  ;;  %p190_p2 = scmp.lt.s32.totalorder %s2294_s14, 3 }
   0x5   : > { %s2689_s15 = smov (%p34_p1, %s32_s15), 0  ;;  %p191_p3 = pnand %p2037_p0, %p190_p2 }
   0x6   : > { %p232_p4 = scmp.lt.s32.totalorder (!%p191_p3), %s2286_s12, 1  ;;  %vm281_vm0 = vcmask (!%p191_p3), 31744   ;;  %v2296_v0 = vmov (!%p191_p3), 0.0   ;;  %vm2297_vm1 = vmmov (!%p191_p3), 0   ;;  %vm264_vm2 = vcmask (!%p191_p3), 7168   ;;  %s2300_s23 = smov (!%p191_p3), 124  }
   0x7   : > { %194 = sbr.rel (%p191_p3) target bundleno = 1550 (0x60e), region = 32  ;;  %2100 = vmatprep.subr.mxu0 (!%p191_p3), %v2296_v0  ;;  %282 = vst.msk [vmem:[#allocation4] sm:$0xff] (!%p191_p3), %vm281_vm0, %v2296_v0  ;;  %283 = vst.msk [vmem:[#allocation4 + $0x8] sm:$0xff] (!%p191_p3), %vm281_vm0, %v2296_v0  ;;  %2102 = vmatprep.mubr.msk.f32.mxu0 (!%p191_p3), %vm2297_vm1, %v2296_v0  ;;  %v2298_v3 = vmov (!%p191_p3), -inf   ;;  %vm372_vm3 = vcmask (!%p191_p3), 64512   ;;  %v2299_v7 = vmov (!%p191_p3), 0  }
   0x8   : > { %284 = vst.msk [vmem:[#allocation4 + $0x10] sm:$0xff] (!%p191_p3), %vm281_vm0, %v2296_v0  ;;  %285 = vst.msk [vmem:[#allocation4 + $0x18] sm:$0xff] (!%p191_p3), %vm281_vm0, %v2296_v0  ;;  %2105 = vmatprep.subr.mxu1 (!%p191_p3), %v2296_v0  ;;  %2107 = vmatprep.mubr.msk.f32.mxu1 (!%p191_p3), %vm2297_vm1, %v2296_v0  ;;  %s2301_s24 = smov (!%p191_p3), 120   ;;  %s2302_s25 = smov (!%p191_p3), 116   ;;  %vm1914_vm4 = vcmask (!%p191_p3), 97280   ;;  %vm1916_vm5 = vcmask (!%p191_p3), 130048  }
   0x9   : > { %286 = vst.msk [vmem:[#allocation4 + $0x20] sm:$0xff] (!%p191_p3), %vm281_vm0, %v2296_v0  ;;  %287 = vst.msk [vmem:[#allocation4 + $0x28] sm:$0xff] (!%p191_p3), %vm281_vm0, %v2296_v0  ;;  %2222 = vset.pattern.permute.xlu0 (!%p191_p3), %v2299_v7  ;;  %2223 = vset.pattern.permute.xlu1 (!%p191_p3), %v2299_v7  ;;  %s2303_s26 = smov (!%p191_p3), 112   ;;  %s2304_s27 = smov (!%p191_p3), 108   ;;  %vm1918_vm6 = vcmask (!%p191_p3), 162816   ;;  %vm1920_vm7 = vcmask (!%p191_p3), 195584  }
   0xa   : > { %288 = vst.msk [vmem:[#allocation4 + $0x30] sm:$0xff] (!%p191_p3), %vm281_vm0, %v2296_v0  ;;  %289 = vst.msk [vmem:[#allocation4 + $0x38] sm:$0xff] (!%p191_p3), %vm281_vm0, %v2296_v0  ;;  %s2305_s28 = smov (!%p191_p3), 104   ;;  %s2306_s29 = smov (!%p191_p3), 100   ;;  %vm1922_vm8 = vcmask (!%p191_p3), 228352   ;;  %vm1924_vm9 = vcmask (!%p191_p3), 261120  }
   0xb   : > { %265 = vst.msk [vmem:[#allocation2] sm:$0xff] (!%p191_p3), %vm264_vm2, %v2298_v3  ;;  %266 = vst.msk [vmem:[#allocation2 + $0x8] sm:$0xff] (!%p191_p3), %vm264_vm2, %v2298_v3  ;;  %s2307_s6 = smov (!%p191_p3), 4   ;;  %s2308_s7 = smov (!%p191_p3), 8  }
   0xc   : > { %267 = vst.msk [vmem:[#allocation2 + $0x10] sm:$0xff] (!%p191_p3), %vm264_vm2, %v2298_v3  ;;  %268 = vst.msk [vmem:[#allocation2 + $0x18] sm:$0xff] (!%p191_p3), %vm264_vm2, %v2298_v3  ;;  %s2309_s8 = smov (!%p191_p3), 12   ;;  %s2310_s9 = smov (!%p191_p3), 16  }
   0xd   : > { %269 = vst.msk [vmem:[#allocation2 + $0x20] sm:$0xff] (!%p191_p3), %vm264_vm2, %v2298_v3  ;;  %270 = vst.msk [vmem:[#allocation2 + $0x28] sm:$0xff] (!%p191_p3), %vm264_vm2, %v2298_v3  ;;  %s2311_s10 = smov (!%p191_p3), 20   ;;  %s2312_s11 = smov (!%p191_p3), 24  }
   0xe   : > { %s2691_s12 = smov (!%p232_p4, %s2286_s12), 1  ;;  %271 = vst.msk [vmem:[#allocation2 + $0x30] sm:$0xff] %vm264_vm2, %v2298_v3  ;;  %272 = vst.msk [vmem:[#allocation2 + $0x38] sm:$0xff] %vm264_vm2, %v2298_v3 }
   0xf   : > { %s2375_s16 = sshll.u32 %s2691_s12, 3  ;;  %273 = vst.msk [vmem:[#allocation3] sm:$0xff] %vm264_vm2, %v2296_v0  ;;  %274 = vst.msk [vmem:[#allocation3 + $0x8] sm:$0xff] %vm264_vm2, %v2296_v0  ;;  %s2313_s12 = smov 28  }
  0x10   : > { %s245_s19 = scalar_lea.vmem %s2683_s1, %s2375_s16  ;;  %s238_s22 = scalar_lea.vmem %s2682_s0, %s2375_s16  ;;  %275 = vst.msk [vmem:[#allocation3 + $0x10] sm:$0xff] %vm264_vm2, %v2296_v0  ;;  %276 = vst.msk [vmem:[#allocation3 + $0x18] sm:$0xff] %vm264_vm2, %v2296_v0 }
  0x11   : > { %v291_v1 = vld [vmem:[%s245_s19] sm:$0xff]  ;;  %277 = vst.msk [vmem:[#allocation3 + $0x20] sm:$0xff] %vm264_vm2, %v2296_v0  ;;  %278 = vst.msk [vmem:[#allocation3 + $0x28] sm:$0xff] %vm264_vm2, %v2296_v0  ;;  %s252_s5 = scalar_lea.vmem %s2684_s2, %s2375_s16  ;;  %s259_s19 = scalar_lea.vmem %s2685_s3, %s2375_s16 }
  0x12   : > { %2101 = vmatpush3.xpose.msk.msra.mxu0 %vm281_vm0, %v291_v1  ;;  %v290_v2 = vld [vmem:[%s238_s22] sm:$0xff]  ;;  %279 = vst.msk [vmem:[#allocation3 + $0x30] sm:$0xff] %vm264_vm2, %v2296_v0  ;;  %280 = vst.msk [vmem:[#allocation3 + $0x38] sm:$0xff] %vm264_vm2, %v2296_v0  ;;  %480 = vrot.lane.b32.xlu1 %v291_v1, %s2300_s23  ;;  %v557_v61 = vld [vmem:[#allocation2 + $0x8] sm:$0xff] }
  0x13   : > { %2115 = vmatprep.subr.mxu0 %v2296_v0  ;;  %v370_v8 = vld [vmem:[#allocation2] sm:$0xff] }
  0x14   : > { %v2434_v12 = vld [vmem:[%s252_s5] sm:$0xff] }
  0x15   : > { %2103 = vmatmul.mubr.msk.f32.vlgmr.msra.gmra.mrb[0].mxu0 %vm281_vm0, %v290_v2  ;;  %2106 = vmatpush3.msra.mxu1 %v2434_v12 }
  0x16   : > { %2117 = vmatprep.mubr.msk.f32.mxu0 %vm2297_vm1, %v2296_v0  ;;  %478 = vrot.lane.b32.xlu1 %v290_v2, %s2300_s23  ;;  %v371_v34 = vld [vmem:[#allocation3] sm:$0xff] }
  0x17   : > { %2110 = vmatprep.subr.mxu1 %v2296_v0 }
  0x1a   : > { %671 = vrot.lane.b32.xlu1 %v291_v1, %s2301_s24 }
  0x1e   : > { %669 = vrot.lane.b32.xlu1 %v290_v2, %s2301_s24 }
  0x22   : > { %861 = vrot.lane.b32.xlu1 %v291_v1, %s2302_s25 }
  0x26   : > { %859 = vrot.lane.b32.xlu1 %v290_v2, %s2302_s25 }
  0x2a   : > { %1051 = vrot.lane.b32.xlu1 %v291_v1, %s2303_s26 }
  0x2e   : > { %1049 = vrot.lane.b32.xlu1 %v290_v2, %s2303_s26 }
  0x32   : > { %1241 = vrot.lane.b32.xlu1 %v291_v1, %s2304_s27 }
  0x36   : > { %1239 = vrot.lane.b32.xlu1 %v290_v2, %s2304_s27 }
  0x3a   : > { %1431 = vrot.lane.b32.xlu1 %v291_v1, %s2305_s28 }
  0x3e   : > { %1429 = vrot.lane.b32.xlu1 %v290_v2, %s2305_s28 }
  0x42   : > { %1619 = vrot.lane.b32.xlu1 %v290_v2, %s2306_s29 }
  0x84   : > { %v481_v13 = vpop.permute.xlu1 %480 }
  0x88   : > { %v479_v14 = vpop.permute.xlu1 %478 }
  0x8c   : > { %v672_v15 = vpop.permute.xlu1 %671 }
  0x90   : > { %v670_v16 = vpop.permute.xlu1 %669 }
  0x94   : > { %v862_v17 = vpop.permute.xlu1 %861 }
  0x98   : > { %v860_v18 = vpop.permute.xlu1 %859 }
  0x9c   : > { %v1052_v22 = vpop.permute.xlu1 %1051 }
  0xa0   : > { %v1050_v23 = vpop.permute.xlu1 %1049 }
  0xa4   : > { %v1242_v26 = vpop.permute.xlu1 %1241 }
  0xa8   : > { %v1240_v27 = vpop.permute.xlu1 %1239 }
  0xac   : > { %v1432_v28 = vpop.permute.xlu1 %1431 }
  0xb0   : > { %v1430_v29 = vpop.permute.xlu1 %1429 }
  0xb4   : > { %v1620_v31 = vpop.permute.xlu1 %1619 }
  0xe8   : > { %v366_v4 = vpop.f32.mrb[0].mxu0 }
  0xe9   : > { %v2104_v5 = vpop.f32.mrb[1].mxu0  ;;  %v373_v6 = vsel %vm372_vm3, %v366_v4, -inf }
  0xea   : > { %374 = vmax.xlane.f32.xlu0 %v373_v6 }
 0x177   : > { %v375_v9 = vpop.xlane.xlu0 %374 }
 0x178   : > { %v376_v10 = vmax.f32 %v370_v8, %v375_v9  ;;  %v2512_v9 = vld [vmem:[#allocation2 + $0x20] sm:$0xff] }
 0x17a   : > { %v377_v11 = vsub.f32 %v370_v8, %v376_v10  ;;  %395 = vst.msk [vmem:[#allocation2] sm:$0xff] %vm264_vm2, %v376_v10  ;;  %382 = vperm.xlu0 %2222, %v376_v10  }
 0x17c   : > { %v378_v32 = vmul.f32 1.442695, %v377_v11 }
 0x17e   : > { %1621 = vrot.lane.b32.xlu0 %v291_v1, %s2306_s29  ;;  %v748_v1 = vld [vmem:[#allocation2 + $0x10] sm:$0xff] }
 0x1f9   : > { %v383_v19 = vpop.permute.xlu0 %382 }
 0x1fa   : > { %v385_v20 = vsub.f32 %v366_v4, %v383_v19 }
 0x1fc   : > { %v386_v21 = vmul.f32 1.442695, %v385_v20 }
 0x1fd   : > { %v1622_v30 = vpop.permute.xlu0 %1621 }
 0x1fe   : > { %2224 = vpow2.f32 %v386_v21 }
 0x1ff   : > { %2226 = vpow2.f32 %v378_v32 }
 0x208   : > { %v2225_v24 = vpop.eup %2224 }
 0x209   : > { %2108 = vmatmul.mubr.msk.f32.vlgmr.msra.gmra.mrb[0].mxu1 %vm372_vm3, %v2225_v24  ;;  %v389_v25 = vsel %vm372_vm3, %v2225_v24, 0.0  ;;  %v2227_v33 = vpop.eup %2226  ;;  %v2547_v24 = vld [vmem:[#allocation2 + $0x18] sm:$0xff] }
 0x20a   : > { %2111 = vmatpush3.xpose.msk.msra.mxu1 %vm281_vm0, %v481_v13  ;;  %390 = vadd.xlane.f32.xlu0 %v389_v25  ;;  %v388_v35 = vmul.f32 %v2227_v33, %v371_v34  ;;  %v2517_v13 = vld [vmem:[#allocation2 + $0x28] sm:$0xff] }
 0x20b   : > { %2112 = vmatprep.mubr.msk.f32.mxu1 %vm2297_vm1, %v2296_v0  ;;  %2120 = vmatprep.subr.mxu1 %v2296_v0 }
 0x20d   : > { %2113 = vmatmul.mubr.msk.f32.vlgmr.msra.gmra.mrb[2].mxu1 %vm281_vm0, %v479_v14 }
 0x20e   : > { %2121 = vmatpush3.xpose.msk.msra.mxu1 %vm281_vm0, %v672_v15  ;;  %2122 = vmatprep.mubr.msk.f32.mxu1 %vm2297_vm1, %v2296_v0 }
 0x20f   : > { %2130 = vmatprep.subr.mxu1 %v2296_v0 }
 0x211   : > { %2123 = vmatmul.mubr.msk.f32.vlgmr.msra.gmra.mrb[4].mxu1 %vm281_vm0, %v670_v16 }
 0x212   : > { %2131 = vmatpush3.xpose.msk.msra.mxu1 %vm281_vm0, %v862_v17  ;;  %2132 = vmatprep.mubr.msk.f32.mxu1 %vm2297_vm1, %v2296_v0 }
 0x213   : > { %2140 = vmatprep.subr.mxu1 %v2296_v0 }
 0x215   : > { %2133 = vmatmul.mubr.msk.f32.vlgmr.msra.gmra.mrb[6].mxu1 %vm281_vm0, %v860_v18  ;;  %v2529_v18 = vld [vmem:[#allocation2 + $0x30] sm:$0xff] }
 0x216   : > { %2141 = vmatpush3.xpose.msk.msra.mxu1 %vm281_vm0, %v1052_v22  ;;  %2142 = vmatprep.mubr.msk.f32.mxu1 %vm2297_vm1, %v2296_v0 }
 0x217   : > { %2150 = vmatprep.subr.mxu1 %v2296_v0 }
 0x219   : > { %2143 = vmatmul.mubr.msk.f32.vlgmr.msra.gmra.mrb[8].mxu1 %vm281_vm0, %v1050_v23 }
 0x21a   : > { %2151 = vmatpush3.xpose.msk.msra.mxu1 %vm281_vm0, %v1242_v26  ;;  %2152 = vmatprep.mubr.msk.f32.mxu1 %vm2297_vm1, %v2296_v0 }
 0x21b   : > { %2160 = vmatprep.subr.mxu1 %v2296_v0 }
 0x21d   : > { %2153 = vmatmul.mubr.msk.f32.vlgmr.msra.gmra.mrb[10].mxu1 %vm281_vm0, %v1240_v27  ;;  %v2552_v27 = vld [vmem:[#allocation2 + $0x38] sm:$0xff] }
 0x21e   : > { %2161 = vmatpush3.xpose.msk.msra.mxu1 %vm281_vm0, %v1432_v28  ;;  %2162 = vmatprep.mubr.msk.f32.mxu1 %vm2297_vm1, %v2296_v0 }
 0x21f   : > { %2170 = vmatprep.subr.mxu1 %v2296_v0 }
 0x221   : > { %2163 = vmatmul.mubr.msk.f32.vlgmr.msra.gmra.mrb[12].mxu1 %vm281_vm0, %v1430_v29 }
 0x222   : > { %2171 = vmatpush3.xpose.msk.msra.mxu1 %vm281_vm0, %v1622_v30  ;;  %2172 = vmatprep.mubr.msk.f32.mxu1 %vm2297_vm1, %v2296_v0 }
 0x225   : > { %2173 = vmatmul.mubr.msk.f32.vlgmr.msra.gmra.mrb[14].mxu1 %vm281_vm0, %v1620_v31  ;;  %v469_v31 = vld [vmem:[#allocation4] sm:$0xff] }
 0x297   : > { %v391_v36 = vpop.xlane.xlu0 %390 }
 0x298   : > { %v392_v37 = vadd.f32 %v391_v36, %v388_v35 }
 0x29a   : > { %394 = vst.msk [vmem:[#allocation3] sm:$0xff] %vm264_vm2, %v392_v37 }
 0x2dc   : > { %v2475_v38 = vpop.f32.mrb[0].mxu1 }
 0x2dd   : > { %v2109_v39 = vpop.f32.mrb[1].mxu1 }
 0x2e0   : > { %v2477_v40 = vpop.f32.mrb[2].mxu1 }
 0x2e1   : > { %v2114_v41 = vpop.f32.mrb[3].mxu1  ;;  %v560_v42 = vsel %vm372_vm3, %v2477_v40, -inf }
 0x2e2   : > { %561 = vmax.xlane.f32.xlu1 %v560_v42 }
 0x2e4   : > { %v2481_v43 = vpop.f32.mrb[4].mxu1 }
 0x2e5   : > { %v751_v44 = vsel %vm372_vm3, %v2481_v43, -inf  ;;  %v2124_v45 = vpop.f32.mrb[5].mxu1 }
 0x2e6   : > { %752 = vmax.xlane.f32.xlu0 %v751_v44 }
 0x2e8   : > { %v2485_v46 = vpop.f32.mrb[6].mxu1 }
 0x2e9   : > { %v2134_v47 = vpop.f32.mrb[7].mxu1  ;;  %v941_v59 = vsel %vm372_vm3, %v2485_v46, -inf }
 0x2ec   : > { %v2487_v48 = vpop.f32.mrb[8].mxu1 }
 0x2ed   : > { %v2144_v49 = vpop.f32.mrb[9].mxu1  ;;  %v1131_v50 = vsel %vm372_vm3, %v2487_v48, -inf }
 0x2ee   : > { %1132 = vmax.xlane.f32.xlu0 %v1131_v50 }
 0x2f0   : > { %v2491_v51 = vpop.f32.mrb[10].mxu1 }
 0x2f1   : > { %v2154_v52 = vpop.f32.mrb[11].mxu1  ;;  %v1321_v53 = vsel %vm372_vm3, %v2491_v51, -inf }
 0x2f2   : > { %1322 = vmax.xlane.f32.xlu0 %v1321_v53 }
 0x2f3   : > { %583 = vrot.lane.b32.xlu1 %v2434_v12, %s2300_s23 }
 0x2f4   : > { %v2497_v54 = vpop.f32.mrb[12].mxu1 }
 0x2f5   : > { %v2164_v55 = vpop.f32.mrb[13].mxu1  ;;  %v1511_v56 = vsel %vm372_vm3, %v2497_v54, -inf }
 0x2f6   : > { %1512 = vmax.xlane.f32.xlu0 %v1511_v56 }
 0x2f8   : > { %v2501_v57 = vpop.f32.mrb[14].mxu1 }
 0x2f9   : > { %v2174_v58 = vpop.f32.mrb[15].mxu1  ;;  %v1701_v60 = vsel %vm372_vm3, %v2501_v57, -inf }
 0x317   : > { %942 = vmax.xlane.f32.xlu1 %v941_v59 }
 0x31b   : > { %1702 = vmax.xlane.f32.xlu1 %v1701_v60 }
 0x32c   : > { %472 = vperm.xlu1 %2223, %v2227_v33  }
 0x330   : > { %773 = vrot.lane.b32.xlu1 %v2434_v12, %s2301_s24 }
 0x36f   : > { %v562_v62 = vpop.xlane.xlu1 %561 }
 0x370   : > { %v563_v63 = vmax.f32 %v557_v61, %v562_v62 }
 0x372   : > { %v564_v2 = vsub.f32 %v557_v61, %v563_v63  ;;  %581 = vst.msk [vmem:[#allocation2 + $0x8] sm:$0xff] %vm264_vm2, %v563_v63  ;;  %569 = vperm.xlu0 %2222, %v563_v63  }
 0x373   : > { %v584_v3 = vpop.permute.xlu1 %583  ;;  %v753_v4 = vpop.xlane.xlu0 %752 }
 0x374   : > { %v565_v5 = vmul.f32 1.442695, %v564_v2  ;;  %v754_v6 = vmax.f32 %v748_v1, %v753_v4  ;;  %2116 = vmatpush3.msra.mxu0 %v584_v3 }
 0x375   : > { %2125 = vmatprep.subr.mxu0 %v2296_v0 }
 0x376   : > { %2228 = vpow2.f32 %v565_v5  ;;  %v755_v7 = vsub.f32 %v748_v1, %v754_v6  ;;  %772 = vst.msk [vmem:[#allocation2 + $0x10] sm:$0xff] %vm264_vm2, %v754_v6  ;;  %760 = vperm.xlu0 %2222, %v754_v6  }
 0x378   : > { %v756_v8 = vmul.f32 1.442695, %v755_v7 }
 0x37a   : > { %2230 = vpow2.f32 %v756_v8 }
 0x37b   : > { %v1133_v10 = vpop.xlane.xlu0 %1132 }
 0x37c   : > { %v2515_v11 = vmax.f32 %v2512_v9, %v1133_v10 }
 0x37e   : > { %v1135_v14 = vsub.f32 %v2512_v9, %v2515_v11  ;;  %1152 = vst.msk [vmem:[#allocation2 + $0x20] sm:$0xff] %vm264_vm2, %v2515_v11 }
 0x37f   : > { %v1323_v15 = vpop.xlane.xlu0 %1322 }
 0x380   : > { %v2523_v16 = vpop.eup %2228  ;;  %v2526_v17 = vmax.f32 %v2517_v13, %v1323_v15 }
 0x381   : > { %663 = vperm.xlu0 %2222, %v2523_v16  }
 0x382   : > { %v1325_v19 = vsub.f32 %v2517_v13, %v2526_v17  ;;  %1342 = vst.msk [vmem:[#allocation2 + $0x28] sm:$0xff] %vm264_vm2, %v2526_v17 }
 0x383   : > { %v1513_v20 = vpop.xlane.xlu0 %1512 }
 0x384   : > { %v2535_v21 = vpop.eup %2230  ;;  %v2538_v22 = vmax.f32 %v2529_v18, %v1513_v20  ;;  %v1326_v7 = vmul.f32 1.442695, %v1325_v19 }
 0x385   : > { %853 = vperm.xlu0 %2222, %v2535_v21  }
 0x386   : > { %v1515_v23 = vsub.f32 %v2529_v18, %v2538_v22  ;;  %1532 = vst.msk [vmem:[#allocation2 + $0x30] sm:$0xff] %vm264_vm2, %v2538_v22 }
 0x389   : > { %1723 = vrot.lane.b32.xlu0 %v2434_v12, %s2306_s29 }
 0x3a4   : > { %v943_v25 = vpop.xlane.xlu1 %942 }
 0x3a5   : > { %v2550_v26 = vmax.f32 %v2547_v24, %v943_v25 }
 0x3a7   : > { %v945_v28 = vsub.f32 %v2547_v24, %v2550_v26  ;;  %962 = vst.msk [vmem:[#allocation2 + $0x18] sm:$0xff] %vm264_vm2, %v2550_v26  ;;  %950 = vperm.xlu1 %2223, %v2550_v26  }
 0x3a8   : > { %v1703_v29 = vpop.xlane.xlu1 %1702 }
 0x3a9   : > { %v2560_v30 = vmax.f32 %v2552_v27, %v1703_v29  ;;  %v559_v29 = vld [vmem:[#allocation3 + $0x8] sm:$0xff] }
 0x3ab   : > { %v1705_v32 = vsub.f32 %v2552_v27, %v2560_v30  ;;  %1722 = vst.msk [vmem:[#allocation2 + $0x38] sm:$0xff] %vm264_vm2, %v2560_v30  ;;  %1140 = vperm.xlu1 %2223, %v2515_v11   ;;  %v1516_v11 = vmul.f32 1.442695, %v1515_v23  ;;  %v1812_v27 = vld [vmem:[#allocation3] sm:$0xff] }
 0x3ac   : > { %v473_v33 = vpop.permute.xlu1 %472 }
 0x3ad   : > { %v475_v34 = vmul.f32 %v473_v33, %v469_v31 }
 0x3af   : > { %v476_v35 = vadd.f32 %v475_v34, %v2475_v38  ;;  %1330 = vperm.xlu1 %2223, %v2526_v17   ;;  %v1706_v17 = vmul.f32 1.442695, %v1705_v32  ;;  %v750_v32 = vld [vmem:[#allocation3 + $0x10] sm:$0xff] }
 0x3b0   : > { %v774_v45 = vpop.permute.xlu1 %773  ;;  %v766_v34 = vmul.f32 %v2535_v21, %v750_v32 }
 0x3b1   : > { %477 = vst.msk [vmem:[#allocation4] sm:$0xff] %vm281_vm0, %v476_v35 }
 0x3b3   : > { %1520 = vperm.xlu1 %2223, %v2538_v22  }
 0x3b7   : > { %1710 = vperm.xlu1 %2223, %v2560_v30   ;;  %v575_v30 = vmul.f32 %v2523_v16, %v559_v29  ;;  %v940_v16 = vld [vmem:[#allocation3 + $0x18] sm:$0xff] }
 0x3bb   : > { %963 = vrot.lane.b32.xlu1 %v2434_v12, %s2302_s25 }
 0x3bf   : > { %1153 = vrot.lane.b32.xlu1 %v2434_v12, %s2303_s26 }
 0x3c3   : > { %1343 = vrot.lane.b32.xlu1 %v2434_v12, %s2304_s27 }
 0x3c7   : > { %1533 = vrot.lane.b32.xlu1 %v2434_v12, %s2305_s28 }
 0x3f1   : > { %v570_v36 = vpop.permute.xlu0 %569 }
 0x3f2   : > { %v572_v37 = vsub.f32 %v2477_v40, %v570_v36 }
 0x3f4   : > { %v573_v38 = vmul.f32 1.442695, %v572_v37 }
 0x3f5   : > { %v761_v39 = vpop.permute.xlu0 %760 }
 0x3f6   : > { %2232 = vpow2.f32 %v573_v38  ;;  %v763_v41 = vsub.f32 %v2481_v43, %v761_v39 }
 0x3f8   : > { %v764_v42 = vmul.f32 1.442695, %v763_v41 }
 0x3fa   : > { %2234 = vpow2.f32 %v764_v42 }
 0x400   : > { %v2233_v44 = vpop.eup %2232  ;;  %v2601_v5 = vpop.permute.xlu0 %663 }
 0x401   : > { %2118 = vmatmul.mubr.msk.f32.vlgmr.msra.gmra.mrb[2].mxu0 %vm372_vm3, %v2233_v44  ;;  %v576_v47 = vsel %vm372_vm3, %v2233_v44, 0.0 }
 0x402   : > { %577 = vadd.xlane.f32.xlu1 %v576_v47  ;;  %2127 = vmatprep.mubr.msk.f32.mxu0 %vm2297_vm1, %v2296_v0 }
 0x403   : > { %2126 = vmatpush3.msra.mxu0 %v774_v45  ;;  %v1130_v45 = vld [vmem:[#allocation3 + $0x20] sm:$0xff] }
 0x404   : > { %v2235_v12 = vpop.eup %2234  ;;  %2135 = vmatprep.subr.mxu0 %v2296_v0  ;;  %v2617_v8 = vpop.permute.xlu0 %853 }
 0x405   : > { %2128 = vmatmul.mubr.msk.f32.vlgmr.msra.gmra.mrb[4].mxu0 %vm372_vm3, %v2235_v12  ;;  %v767_v40 = vsel %vm372_vm3, %v2235_v12, 0.0 }
 0x406   : > { %768 = vadd.xlane.f32.xlu1 %v767_v40  ;;  %2137 = vmatprep.mubr.msk.f32.mxu0 %vm2297_vm1, %v2296_v0 }
 0x426   : > { %v951_v43 = vpop.permute.xlu1 %950 }
 0x427   : > { %v953_v49 = vsub.f32 %v2485_v46, %v951_v43 }
 0x429   : > { %v954_v50 = vmul.f32 1.442695, %v953_v49  ;;  %v660_v49 = vld [vmem:[#allocation4 + $0x8] sm:$0xff] }
 0x42a   : > { %v1141_v52 = vpop.permute.xlu1 %1140 }
 0x42b   : > { %2236 = vpow2.f32 %v954_v50  ;;  %v1143_v53 = vsub.f32 %v2487_v48, %v1141_v52  ;;  %v666_v52 = vmul.f32 %v2601_v5, %v660_v49 }
 0x42d   : > { %v1144_v55 = vmul.f32 1.442695, %v1143_v53  ;;  %v850_v53 = vld [vmem:[#allocation4 + $0x10] sm:$0xff] }
 0x42e   : > { %v1331_v56 = vpop.permute.xlu1 %1330 }
 0x42f   : > { %2238 = vpow2.f32 %v1144_v55  ;;  %v1333_v58 = vsub.f32 %v2491_v51, %v1331_v56  ;;  %v946_v51 = vmul.f32 1.442695, %v945_v28 }
 0x431   : > { %v1334_v61 = vmul.f32 1.442695, %v1333_v58 }
 0x432   : > { %v1521_v59 = vpop.permute.xlu1 %1520 }
 0x433   : > { %v1523_v62 = vsub.f32 %v2497_v54, %v1521_v59  ;;  %2240 = vpow2.f32 %v1334_v61  ;;  %v856_v59 = vmul.f32 %v2617_v8, %v850_v53 }
 0x435   : > { %v2237_v60 = vpop.eup %2236  ;;  %v1524_v2 = vmul.f32 1.442695, %v1523_v62 }
 0x436   : > { %v1711_v63 = vpop.permute.xlu1 %1710  ;;  %v957_v1 = vsel %vm372_vm3, %v2237_v60, 0.0 }
 0x437   : > { %958 = vadd.xlane.f32.xlu0 %v957_v1  ;;  %v1713_v3 = vsub.f32 %v2501_v57, %v1711_v63  ;;  %2242 = vpow2.f32 %v1524_v2  ;;  %v1136_v57 = vmul.f32 1.442695, %v1135_v14  ;;  %v1724_v14 = vpop.permute.xlu0 %1723  ;;  %v1320_v2 = vld [vmem:[#allocation3 + $0x28] sm:$0xff] }
 0x438   : > { %2244 = vpow2.f32 %v946_v51 }
 0x439   : > { %v2239_v46 = vpop.eup %2238  ;;  %v1714_v54 = vmul.f32 1.442695, %v1713_v3 }
 0x43a   : > { %v964_v48 = vpop.permute.xlu1 %963  ;;  %v1147_v4 = vsel %vm372_vm3, %v2239_v46, 0.0 }
 0x43b   : > { %1148 = vadd.xlane.f32.xlu1 %v1147_v4  ;;  %2136 = vmatpush3.msra.mxu0 %v964_v48  ;;  %2246 = vpow2.f32 %v1714_v54  ;;  %v1510_v4 = vld [vmem:[#allocation3 + $0x30] sm:$0xff] }
 0x43c   : > { %2138 = vmatmul.mubr.msk.f32.vlgmr.msra.gmra.mrb[6].mxu0 %vm372_vm3, %v2237_v60  ;;  %2145 = vmatprep.subr.mxu0 %v2296_v0  ;;  %2248 = vpow2.f32 %v1136_v57  ;;  %v1700_v57 = vld [vmem:[#allocation3 + $0x38] sm:$0xff] }
 0x43d   : > { %2147 = vmatprep.mubr.msk.f32.mxu0 %vm2297_vm1, %v2296_v0  ;;  %v2241_v10 = vpop.eup %2240  ;;  %2250 = vpow2.f32 %v1326_v7 }
 0x43e   : > { %v1154_v6 = vpop.permute.xlu1 %1153  ;;  %2252 = vpow2.f32 %v1516_v11 }
 0x43f   : > { %2146 = vmatpush3.msra.mxu0 %v1154_v6  ;;  %2254 = vpow2.f32 %v1706_v17 }
 0x440   : > { %2148 = vmatmul.mubr.msk.f32.vlgmr.msra.gmra.mrb[8].mxu0 %vm372_vm3, %v2239_v46  ;;  %2155 = vmatprep.subr.mxu0 %v2296_v0  ;;  %2256 = vrcp.f32 %v1812_v27 }
 0x441   : > { %2157 = vmatprep.mubr.msk.f32.mxu0 %vm2297_vm1, %v2296_v0  ;;  %v2243_v15 = vpop.eup %2242 }
 0x442   : > { %v1344_v9 = vpop.permute.xlu1 %1343  ;;  %v2245_v18 = vpop.eup %2244  ;;  %v1527_v25 = vsel %vm372_vm3, %v2243_v15, 0.0 }
 0x443   : > { %2156 = vmatpush3.msra.mxu0 %v1344_v9  ;;  %v956_v42 = vmul.f32 %v2245_v18, %v940_v16 }
 0x444   : > { %2158 = vmatmul.mubr.msk.f32.vlgmr.msra.gmra.mrb[10].mxu0 %vm372_vm3, %v2241_v10  ;;  %2165 = vmatprep.subr.mxu0 %v2296_v0 }
 0x445   : > { %2167 = vmatprep.mubr.msk.f32.mxu0 %vm2297_vm1, %v2296_v0  ;;  %v2247_v19 = vpop.eup %2246 }
 0x446   : > { %v1534_v13 = vpop.permute.xlu1 %1533  ;;  %v2249_v20 = vpop.eup %2248  ;;  %v1717_v26 = vsel %vm372_vm3, %v2247_v19, 0.0 }
 0x447   : > { %2166 = vmatpush3.msra.mxu0 %v1534_v13  ;;  %v2634_v22 = vpop.eup %2250  ;;  %v1146_v21 = vmul.f32 %v2249_v20, %v1130_v45 }
 0x448   : > { %2168 = vmatmul.mubr.msk.f32.vlgmr.msra.gmra.mrb[12].mxu0 %vm372_vm3, %v2243_v15  ;;  %2175 = vmatprep.subr.mxu0 %v2296_v0  ;;  %v2637_v23 = vpop.eup %2252  ;;  %v1336_v3 = vmul.f32 %v2634_v22, %v1320_v2 }
 0x449   : > { %2176 = vmatpush3.msra.mxu0 %v1724_v14  ;;  %2177 = vmatprep.mubr.msk.f32.mxu0 %vm2297_vm1, %v2296_v0  ;;  %v2640_v24 = vpop.eup %2254  ;;  %v1337_v0 = vsel %vm372_vm3, %v2241_v10, 0.0  ;;  %v1526_v5 = vmul.f32 %v2637_v23, %v1510_v4  ;;  %v1040_v14 = vld [vmem:[#allocation4 + $0x18] sm:$0xff] }
 0x44a   : > { %v2257_v28 = vpop.eup %2256  ;;  %v1716_v7 = vmul.f32 %v2640_v24, %v1700_v57  ;;  %v1814_v57 = vld [vmem:[#allocation4] sm:$0xff] }
 0x44c   : > { %1043 = vperm.xlu1 %2223, %v2245_v18   ;;  %2178 = vmatmul.mubr.msk.f32.vlgmr.msra.gmra.mrb[14].mxu0 %vm372_vm3, %v2247_v19  ;;  %v1230_v19 = vld [vmem:[#allocation4 + $0x20] sm:$0xff] }
 0x44d   : > { %1233 = vperm.xlu0 %2222, %v2249_v20  }
 0x450   : > { %1423 = vperm.xlu1 %2223, %v2634_v22  }
 0x454   : > { %1613 = vperm.xlu1 %2223, %v2637_v23  }
 0x458   : > { %1803 = vperm.xlu1 %2223, %v2640_v24  }
 0x46c   : > { %1338 = vadd.xlane.f32.xlu0 %v1337_v0 }
 0x470   : > { %1528 = vadd.xlane.f32.xlu0 %v1527_v25 }
 0x474   : > { %1718 = vadd.xlane.f32.xlu0 %v1717_v26  ;;  %v1420_v26 = vld [vmem:[#allocation4 + $0x28] sm:$0xff] }
 0x48a   : > { %1817 = vperm.xlu0 %2222, %v2257_v28  }
 0x48f   : > { %v578_v31 = vpop.xlane.xlu1 %577 }
 0x490   : > { %v579_v33 = vadd.f32 %v578_v31, %v575_v30 }
 0x492   : > { %580 = vst.msk [vmem:[#allocation3 + $0x8] sm:$0xff] %vm264_vm2, %v579_v33  ;;  %v1610_v33 = vld [vmem:[#allocation4 + $0x30] sm:$0xff] }
 0x493   : > { %v769_v35 = vpop.xlane.xlu1 %768 }
 0x494   : > { %v770_v36 = vadd.f32 %v769_v35, %v766_v34 }
 0x496   : > { %771 = vst.msk [vmem:[#allocation3 + $0x10] sm:$0xff] %vm264_vm2, %v770_v36 }
 0x499   : > { %v1821_v37 = vld [vmem:[#allocation3 + $0x8] sm:$0xff] }
 0x49a   : > { %2258 = vrcp.f32 %v1821_v37 }
 0x49d   : > { %v1830_v38 = vld [vmem:[#allocation3 + $0x10] sm:$0xff] }
 0x49e   : > { %2260 = vrcp.f32 %v1830_v38  ;;  %v1800_v38 = vld [vmem:[#allocation4 + $0x38] sm:$0xff] }
 0x4a4   : > { %v2259_v39 = vpop.eup %2258 }
 0x4a5   : > { %1826 = vperm.xlu1 %2223, %v2259_v39  }
 0x4a8   : > { %v2261_v41 = vpop.eup %2260 }
 0x4a9   : > { %1835 = vperm.xlu1 %2223, %v2261_v41  }
 0x4c4   : > { %v959_v44 = vpop.xlane.xlu0 %958 }
 0x4c5   : > { %v960_v47 = vadd.f32 %v959_v44, %v956_v42 }
 0x4c7   : > { %961 = vst.msk [vmem:[#allocation3 + $0x18] sm:$0xff] %vm264_vm2, %v960_v47 }
 0x4c8   : > { %v1149_v12 = vpop.xlane.xlu1 %1148 }
 0x4c9   : > { %v1150_v40 = vadd.f32 %v1149_v12, %v1146_v21 }
 0x4cb   : > { %1151 = vst.msk [vmem:[#allocation3 + $0x20] sm:$0xff] %vm264_vm2, %v1150_v40 }
 0x4cc   : > { %v1234_v46 = vpop.permute.xlu0 %1233  ;;  %v1044_v13 = vpop.permute.xlu1 %1043 }
 0x4cd   : > { %v1046_v18 = vmul.f32 %v1044_v13, %v1040_v14  ;;  %v1236_v25 = vmul.f32 %v1234_v46, %v1230_v19 }
 0x4ce   : > { %v1839_v43 = vld [vmem:[#allocation3 + $0x18] sm:$0xff] }
 0x4cf   : > { %2262 = vrcp.f32 %v1839_v43 }
 0x4d0   : > { %v1424_v20 = vpop.permute.xlu1 %1423 }
 0x4d1   : > { %v1426_v32 = vmul.f32 %v1424_v20, %v1420_v26 }
 0x4d2   : > { %v1848_v50 = vld [vmem:[#allocation3 + $0x20] sm:$0xff] }
 0x4d3   : > { %2264 = vrcp.f32 %v1848_v50 }
 0x4d4   : > { %v655_v55 = vpop.f32.mrb[2].mxu0  ;;  %v1614_v30 = vpop.permute.xlu1 %1613 }
 0x4d5   : > { %v667_v56 = vadd.f32 %v666_v52, %v655_v55  ;;  %v2119_v58 = vpop.f32.mrb[3].mxu0  ;;  %v1616_v37 = vmul.f32 %v1614_v30, %v1610_v33 }
 0x4d7   : > { %668 = vst.msk [vmem:[#allocation4 + $0x8] sm:$0xff] %vm281_vm0, %v667_v56 }
 0x4d8   : > { %v845_v60 = vpop.f32.mrb[4].mxu0  ;;  %v1804_v39 = vpop.permute.xlu1 %1803 }
 0x4d9   : > { %v2263_v61 = vpop.eup %2262  ;;  %v857_v62 = vadd.f32 %v856_v59, %v845_v60  ;;  %v2129_v63 = vpop.f32.mrb[5].mxu0  ;;  %v1806_v44 = vmul.f32 %v1804_v39, %v1800_v38 }
 0x4da   : > { %1844 = vperm.xlu1 %2223, %v2263_v61  }
 0x4db   : > { %858 = vst.msk [vmem:[#allocation4 + $0x10] sm:$0xff] %vm281_vm0, %v857_v62 }
 0x4dd   : > { %v2265_v1 = vpop.eup %2264 }
 0x4de   : > { %1853 = vperm.xlu1 %2223, %v2265_v1   ;;  %v1823_v40 = vld [vmem:[#allocation4 + $0x8] sm:$0xff] }
 0x4e2   : > { %v1832_v50 = vld [vmem:[#allocation4 + $0x10] sm:$0xff] }
 0x4f9   : > { %v1339_v48 = vpop.xlane.xlu0 %1338 }
 0x4fa   : > { %v1340_v51 = vadd.f32 %v1339_v48, %v1336_v3 }
 0x4fc   : > { %1341 = vst.msk [vmem:[#allocation3 + $0x28] sm:$0xff] %vm264_vm2, %v1340_v51 }
 0x4fd   : > { %v1529_v54 = vpop.xlane.xlu0 %1528 }
 0x4fe   : > { %v1530_v6 = vadd.f32 %v1529_v54, %v1526_v5 }
 0x500   : > { %1531 = vst.msk [vmem:[#allocation3 + $0x30] sm:$0xff] %vm264_vm2, %v1530_v6 }
 0x501   : > { %v1719_v8 = vpop.xlane.xlu0 %1718 }
 0x502   : > { %v1720_v9 = vadd.f32 %v1719_v8, %v1716_v7 }
 0x503   : > { %v1857_v10 = vld [vmem:[#allocation3 + $0x28] sm:$0xff] }
 0x504   : > { %1721 = vst.msk [vmem:[#allocation3 + $0x38] sm:$0xff] %vm264_vm2, %v1720_v9  ;;  %2266 = vrcp.f32 %v1857_v10 }
 0x507   : > { %v1866_v11 = vld [vmem:[#allocation3 + $0x30] sm:$0xff] }
 0x508   : > { %2268 = vrcp.f32 %v1866_v11 }
 0x509   : > { %v1818_v1 = vpop.permute.xlu0 %1817 }
 0x50a   : > { %v1820_v7 = vmul.f32 %v1818_v1, %v1814_v57 }
 0x50b   : > { %v1875_v15 = vld [vmem:[#allocation3 + $0x38] sm:$0xff] }
 0x50c   : > { %2270 = vrcp.f32 %v1875_v15 }
 0x50e   : > { %v2267_v17 = vpop.eup %2266 }
 0x50f   : > { %1862 = vperm.xlu1 %2223, %v2267_v17   ;;  %v1035_v22 = vpop.f32.mrb[6].mxu0 }
 0x510   : > { %v1047_v23 = vadd.f32 %v1046_v18, %v1035_v22  ;;  %v2139_v24 = vpop.f32.mrb[7].mxu0 }
 0x512   : > { %v2269_v0 = vpop.eup %2268  ;;  %1048 = vst.msk [vmem:[#allocation4 + $0x18] sm:$0xff] %vm281_vm0, %v1047_v23 }
 0x513   : > { %1871 = vperm.xlu1 %2223, %v2269_v0   ;;  %v1225_v27 = vpop.f32.mrb[8].mxu0 }
 0x514   : > { %v1237_v28 = vadd.f32 %v1236_v25, %v1225_v27  ;;  %v2149_v29 = vpop.f32.mrb[9].mxu0 }
 0x516   : > { %v2271_v31 = vpop.eup %2270  ;;  %1238 = vst.msk [vmem:[#allocation4 + $0x20] sm:$0xff] %vm281_vm0, %v1237_v28 }
 0x517   : > { %1880 = vperm.xlu0 %2222, %v2271_v31   ;;  %v1415_v34 = vpop.f32.mrb[10].mxu0 }
 0x518   : > { %v1427_v35 = vadd.f32 %v1426_v32, %v1415_v34  ;;  %v2159_v36 = vpop.f32.mrb[11].mxu0 }
 0x519   : > { %v1841_v55 = vld [vmem:[#allocation4 + $0x18] sm:$0xff] }
 0x51a   : > { %1428 = vst.msk [vmem:[#allocation4 + $0x28] sm:$0xff] %vm281_vm0, %v1427_v35 }
 0x51b   : > { %v1605_v41 = vpop.f32.mrb[12].mxu0 }
 0x51c   : > { %v1617_v16 = vadd.f32 %v1616_v37, %v1605_v41  ;;  %v2169_v42 = vpop.f32.mrb[13].mxu0 }
 0x51d   : > { %v1850_v59 = vld [vmem:[#allocation4 + $0x20] sm:$0xff] }
 0x51e   : > { %1618 = vst.msk [vmem:[#allocation4 + $0x30] sm:$0xff] %vm281_vm0, %v1617_v16 }
 0x51f   : > { %v1795_v45 = vpop.f32.mrb[14].mxu0 }
 0x520   : > { %v1807_v47 = vadd.f32 %v1806_v44, %v1795_v45  ;;  %v2179_v21 = vpop.f32.mrb[15].mxu0 }
 0x521   : > { %v1859_v62 = vld [vmem:[#allocation4 + $0x28] sm:$0xff] }
 0x522   : > { %1808 = vst.msk [vmem:[#allocation4 + $0x38] sm:$0xff] %vm281_vm0, %v1807_v47 }
 0x524   : > { %v1827_v12 = vpop.permute.xlu1 %1826 }
 0x525   : > { %v1829_v43 = vmul.f32 %v1827_v12, %v1823_v40  ;;  %v1868_v2 = vld [vmem:[#allocation4 + $0x30] sm:$0xff] }
 0x527   : > { %1885 = vrot.lane.b32.xlu1 %v1829_v43, %s2307_s6 }
 0x528   : > { %v1836_v49 = vpop.permute.xlu1 %1835 }
 0x529   : > { %v1838_v52 = vmul.f32 %v1836_v49, %v1832_v50  ;;  %v1877_v4 = vld [vmem:[#allocation4 + $0x38] sm:$0xff] }
 0x52b   : > { %1889 = vrot.lane.b32.xlu0 %v1838_v52, %s2308_s7 }
 0x559   : > { %v1845_v53 = vpop.permute.xlu1 %1844 }
 0x55a   : > { %v1847_v56 = vmul.f32 %v1845_v53, %v1841_v55 }
 0x55c   : > { %1893 = vrot.lane.b32.xlu1 %v1847_v56, %s2309_s8 }
 0x55d   : > { %v1854_v58 = vpop.permute.xlu1 %1853 }
 0x55e   : > { %v1856_v60 = vmul.f32 %v1854_v58, %v1850_v59 }
 0x560   : > { %1897 = vrot.lane.b32.xlu0 %v1856_v60, %s2310_s9 }
 0x58e   : > { %v1863_v61 = vpop.permute.xlu1 %1862 }
 0x58f   : > { %v1865_v63 = vmul.f32 %v1863_v61, %v1859_v62 }
 0x591   : > { %1901 = vrot.lane.b32.xlu1 %v1865_v63, %s2311_s10 }
 0x592   : > { %v1872_v46 = vpop.permute.xlu1 %1871 }
 0x593   : > { %v1874_v3 = vmul.f32 %v1872_v46, %v1868_v2 }
 0x595   : > { %1905 = vrot.lane.b32.xlu0 %v1874_v3, %s2312_s11 }
 0x596   : > { %v1881_v48 = vpop.permute.xlu0 %1880 }
 0x597   : > { %v1883_v51 = vmul.f32 %v1881_v48, %v1877_v4 }
 0x599   : > { %1909 = vrot.lane.b32.xlu1 %v1883_v51, %s2313_s12  ;;  %v1886_v5 = vpop.permute.xlu1 %1885 }
 0x59a   : > { %v1912_v9 = vsel %vm281_vm0, %v1820_v7, %v1886_v5 }
 0x59d   : > { %v1890_v54 = vpop.permute.xlu0 %1889 }
 0x59e   : > { %v1913_v10 = vsel %vm372_vm3, %v1912_v9, %v1890_v54 }
 0x5ce   : > { %v1894_v6 = vpop.permute.xlu1 %1893 }
 0x5cf   : > { %v1915_v13 = vsel %vm1914_vm4, %v1913_v10, %v1894_v6 }
 0x5d2   : > { %v1898_v8 = vpop.permute.xlu0 %1897 }
 0x5d3   : > { %v1917_v15 = vsel %vm1916_vm5, %v1915_v13, %v1898_v8 }
 0x603   : > { %v1902_v11 = vpop.permute.xlu1 %1901 }
 0x604   : > { %v1919_v17 = vsel %vm1918_vm6, %v1917_v15, %v1902_v11 }
 0x607   : > { %v1906_v14 = vpop.permute.xlu0 %1905 }
 0x608   : > { %v1921_v18 = vsel %vm1920_vm7, %v1919_v17, %v1906_v14 }
 0x60b   : > { %v1910_v19 = vpop.permute.xlu1 %1909 }
 0x60c   : > { %v1923_v20 = vsel %vm1922_vm8, %v1921_v18, %v1910_v19 }
 0x60d   : > { %1925 = vst.msk [vmem:[%s259_s19] sm:$0xff] %vm1924_vm9, %v1923_v20 }
 0x60e PF: > { %s13_s14 = sadd.s32 1, %s2294_s14   ;;  %s2686_s12 = smov %s2290_s13 }
 0x60f   : > { %p10_p5 = scmp.ge.s32.totalorder %s13_s14, 4   ;;  %s2687_s13 = smov %s2689_s15 }
 0x611   :  { %12 = sbr.rel (!%p10_p5) target bundleno = 2 (0x2), region = 97 }

</bundles_post_ra>
